<compile_context>
chip_gen: v7x
topology: tpu7x:2x2x1
jax: 0.10.0
libtpu: 0.0.40
codegen_flags: <defaults>
</compile_context>

<pallas_src>
import jax
import jax.numpy as jnp
import numpy as np
from jax.experimental import pallas as pl
from jax.experimental.pallas import tpu as pltpu

BN_EPS = 1e-5


def _round_up(x, m):
    return (x + m - 1) // m * m


def _make_fused_kernel(Wp, Mw, Dp, inv_cnt):
    """Build the fused (conv1+BN1+ReLU -> conv2+BN2+ReLU) kernel body."""
    taps = [dy * Wp + dx for dy in range(3) for dx in range(3)]

    def conv_bn_relu(load, w_ref, g_ref, be_ref, mask):
        # 3x3 conv as 9 accumulated MXU matmuls over lane-shifted windows.
        acc = jnp.dot(w_ref[0], load(taps[0]),
                      preferred_element_type=jnp.float32)
        for t in range(1, 9):
            acc = acc + jnp.dot(w_ref[t], load(taps[t]),
                                preferred_element_type=jnp.float32)
        # Training-mode BatchNorm over the valid pixels only (masked),
        # single-pass stats folded into per-channel scale/shift, then ReLU.
        am = acc * mask
        mean = jnp.sum(am, axis=1, keepdims=True) * inv_cnt
        var = jnp.maximum(
            jnp.sum(am * am, axis=1, keepdims=True) * inv_cnt - mean * mean,
            0.0)
        scale = g_ref[...] * jax.lax.rsqrt(var + BN_EPS)
        shift = be_ref[...] - mean * scale
        return jnp.maximum(acc * scale + shift, 0.0)

    def kernel(x_ref, w1_ref, g1_ref, be1_ref, w2_ref, g2_ref, be2_ref,
               mc_ref, ma_ref, o_ref, pad_ref):
        mask_c = mc_ref[...]   # (1, Mw): valid "center" pixels for stage 1
        mask_a = ma_ref[...]   # (1, Mw): valid "anchor" pixels for stage 2

        # ---- stage 1: conv1 + BN1 + ReLU.
        # Stage-1 outputs are indexed at padded-grid *centers*, so masking the
        # result directly yields the zero-padded y1 image needed by conv2.
        y1 = conv_bn_relu(lambda s: x_ref[:, pl.ds(s, Mw)],
                          w1_ref, g1_ref, be1_ref, mask_c)

        # Keep y1 on-chip in a VMEM scratch slab; zero only the halo tail
        # (the leading Mw lanes are overwritten just below).
        pad_ref[:, pl.ds(Mw, Dp - Mw)] = jnp.zeros(
            (pad_ref.shape[0], Dp - Mw), jnp.float32)
        pad_ref[:, pl.ds(0, Mw)] = y1 * mask_c

        # ---- stage 2: conv2 + BN2 + ReLU (outputs at top-left anchors).
        o_ref[...] = conv_bn_relu(lambda s: pad_ref[:, pl.ds(s, Mw)],
                                  w2_ref, g2_ref, be2_ref, mask_a)

    return kernel


@jax.jit
def double_conv(x_nchw, w1, b1, g1, be1, w2, b2, g2, be2):
    # Conv biases cancel exactly against the training-mode BN mean subtraction.
    del b1, b2
    N, Cin, H, W = x_nchw.shape
    Cmid = w1.shape[0]
    Cout = w2.shape[0]
    Hp, Wp = H + 2, W + 2
    Mp = N * Hp * Wp                   # flattened padded pixel count (valid)
    Mw = _round_up(Mp, 128)            # lane-aligned compute / output width
    halo = Wp + 1                      # max 3x3 tap offset in the flat layout
    D = _round_up(max(halo + Mp, 2 * halo + Mw), 128)   # slab width w/ halos
    cnt = N * H * W                    # pixels entering the BN batch stats

    x = x_nchw.astype(jnp.float32)
    # NCHW -> (Cin, N, Hp, Wp) zero-padded -> flat (Cin, Mp), placed at lane
    # offset `halo` inside a (Cin, D) slab so all 9 tap offsets are >= 0.
    xp = jnp.pad(jnp.transpose(x, (1, 0, 2, 3)),
                 ((0, 0), (0, 0), (1, 1), (1, 1)))
    xbuf = jnp.pad(xp.reshape(Cin, Mp), ((0, 0), (halo, D - Mp - halo)))

    # PyTorch (C_out, C_in, 3, 3) -> (9, C_out, C_in), tap index = dy*3 + dx.
    w1r = jnp.transpose(w1, (2, 3, 0, 1)).reshape(9, Cmid, Cin)
    w2r = jnp.transpose(w2, (2, 3, 0, 1)).reshape(9, Cout, Cmid)

    # Validity masks in the flat padded layout, padded to the lane width Mw.
    mask_c = jnp.zeros((N, Hp, Wp), jnp.float32).at[:, 1:H + 1, 1:W + 1].set(1.0)
    mask_a = jnp.zeros((N, Hp, Wp), jnp.float32).at[:, :H, :W].set(1.0)
    mask_c = jnp.pad(mask_c.reshape(1, Mp), ((0, 0), (0, Mw - Mp)))
    mask_a = jnp.pad(mask_a.reshape(1, Mp), ((0, 0), (0, Mw - Mp)))

    kernel = _make_fused_kernel(Wp, Mw, D, 1.0 / cnt)

    out = pl.pallas_call(
        kernel,
        out_shape=jax.ShapeDtypeStruct((Cout, Mw), jnp.float32),
        grid=(1,),
        in_specs=[
            pl.BlockSpec((Cin, D), lambda i: (0, 0)),
            pl.BlockSpec((9, Cmid, Cin), lambda i: (0, 0, 0)),
            pl.BlockSpec((Cmid, 1), lambda i: (0, 0)),
            pl.BlockSpec((Cmid, 1), lambda i: (0, 0)),
            pl.BlockSpec((9, Cout, Cmid), lambda i: (0, 0, 0)),
            pl.BlockSpec((Cout, 1), lambda i: (0, 0)),
            pl.BlockSpec((Cout, 1), lambda i: (0, 0)),
            pl.BlockSpec((1, Mw), lambda i: (0, 0)),
            pl.BlockSpec((1, Mw), lambda i: (0, 0)),
        ],
        out_specs=pl.BlockSpec((Cout, Mw), lambda i: (0, 0)),
        scratch_shapes=[pltpu.VMEM((Cmid, D), jnp.float32)],
        compiler_params=pltpu.CompilerParams(
            dimension_semantics=("arbitrary",)),
    )(xbuf, w1r, g1[:, None], be1[:, None], w2r, g2[:, None], be2[:, None],
      mask_c, mask_a)

    # (Cout, Mw) anchor space -> drop lane padding -> (N, Cout, H, W).
    out = out[:, :Mp].reshape(Cout, N, Hp, Wp)[:, :, :H, :W]
    return jnp.transpose(out, (1, 0, 2, 3))


# ---------------------------------------------------------------------------
# Pure-JAX reference (sanity check of the fused Pallas path)
# ---------------------------------------------------------------------------
def ref_double_conv(x, w1, b1, g1, be1, w2, b2, g2, be2):
    def conv(x, w, b):
        y = jax.lax.conv_general_dilated(
            x, w, window_strides=(1, 1), padding="SAME",
            dimension_numbers=("NCHW", "OIHW", "NCHW"))
        return y + b[None, :, None, None]

    def bn_relu(y, g, be):
        mean = jnp.mean(y, axis=(0, 2, 3), keepdims=True)
        var = jnp.mean((y - mean) ** 2, axis=(0, 2, 3), keepdims=True)
        z = (y - mean) * jax.lax.rsqrt(var + BN_EPS)
        z = z * g[None, :, None, None] + be[None, :, None, None]
        return jnp.maximum(z, 0.0)

    y = bn_relu(conv(x, w1, b1), g1, be1)
    return bn_relu(conv(y, w2, b2), g2, be2)


if __name__ == "__main__":
    # DoubleConv(in_channels=4, out_channels=8), input x: (2, 4, 16, 16) NCHW
    N, Cin, Cout, H, W = 2, 4, 8, 16, 16

    key = jax.random.PRNGKey(0)
    kx, kw1, kb1, kw2, kb2 = jax.random.split(key, 5)

    x = jax.random.normal(kx, (N, Cin, H, W), dtype=jnp.float32)

    # Deterministic synthetic parameters (shapes follow the nn.Module __init__).
    w1 = 0.1 * jax.random.normal(kw1, (Cout, Cin, 3, 3), dtype=jnp.float32)
    b1 = 0.1 * jax.random.normal(kb1, (Cout,), dtype=jnp.float32)
    g1 = jnp.ones((Cout,), jnp.float32)      # BN gamma (PyTorch default init)
    be1 = jnp.zeros((Cout,), jnp.float32)    # BN beta
    w2 = 0.1 * jax.random.normal(kw2, (Cout, Cout, 3, 3), dtype=jnp.float32)
    b2 = 0.1 * jax.random.normal(kb2, (Cout,), dtype=jnp.float32)
    g2 = jnp.ones((Cout,), jnp.float32)
    be2 = jnp.zeros((Cout,), jnp.float32)

    out = double_conv(x, w1, b1, g1, be1, w2, b2, g2, be2)
    out = jax.block_until_ready(out)

    ref = jax.block_until_ready(
        ref_double_conv(x, w1, b1, g1, be1, w2, b2, g2, be2))

    assert out.shape == (N, Cout, H, W), out.shape
    np.testing.assert_allclose(np.asarray(out), np.asarray(ref),
                               rtol=5e-3, atol=5e-3)
    print("KERNEL_OK")
</pallas_src>

<mosaic_0001>
module attributes {stable_mosaic.version = 11 : i64} {
  func.func @kernel(%arg0: i32, %arg1: memref<4x896xf32, #tpu.memory_space<vmem>>, %arg2: memref<9x8x4xf32, #tpu.memory_space<vmem>>, %arg3: memref<8x1xf32, #tpu.memory_space<vmem>>, %arg4: memref<8x1xf32, #tpu.memory_space<vmem>>, %arg5: memref<9x8x8xf32, #tpu.memory_space<vmem>>, %arg6: memref<8x1xf32, #tpu.memory_space<vmem>>, %arg7: memref<8x1xf32, #tpu.memory_space<vmem>>, %arg8: memref<1x768xf32, #tpu.memory_space<vmem>>, %arg9: memref<1x768xf32, #tpu.memory_space<vmem>>, %arg10: memref<8x768xf32, #tpu.memory_space<vmem>>, %arg11: memref<8x896xf32, #tpu.memory_space<vmem>>) attributes {dimension_semantics = [#tpu.dimension_semantics<arbitrary>], iteration_bounds = array<i64: 1>, scalar_prefetch = 0 : i64, scratch_operands = 1 : i64, tpu.core_type = #tpu.core_type<tc>, window_params = [{pipeline_mode = #tpu.pipeline_mode<synchronous>, transform_indices = @transform_0, window_bounds = array<i64: 4, 896>}, {pipeline_mode = #tpu.pipeline_mode<synchronous>, transform_indices = @transform_1, window_bounds = array<i64: 9, 8, 4>}, {pipeline_mode = #tpu.pipeline_mode<synchronous>, transform_indices = @transform_2, window_bounds = array<i64: 8, 1>}, {pipeline_mode = #tpu.pipeline_mode<synchronous>, transform_indices = @transform_3, window_bounds = array<i64: 8, 1>}, {pipeline_mode = #tpu.pipeline_mode<synchronous>, transform_indices = @transform_4, window_bounds = array<i64: 9, 8, 8>}, {pipeline_mode = #tpu.pipeline_mode<synchronous>, transform_indices = @transform_5, window_bounds = array<i64: 8, 1>}, {pipeline_mode = #tpu.pipeline_mode<synchronous>, transform_indices = @transform_6, window_bounds = array<i64: 8, 1>}, {pipeline_mode = #tpu.pipeline_mode<synchronous>, transform_indices = @transform_7, window_bounds = array<i64: 1, 768>}, {pipeline_mode = #tpu.pipeline_mode<synchronous>, transform_indices = @transform_8, window_bounds = array<i64: 1, 768>}, {pipeline_mode = #tpu.pipeline_mode<synchronous>, transform_indices = @transform_9, window_bounds = array<i64: 8, 768>}]} {
    %c0 = arith.constant 0 : index
    %c0_0 = arith.constant 0 : index
    %0 = vector.load %arg8[%c0, %c0_0] : memref<1x768xf32, #tpu.memory_space<vmem>>, vector<1x768xf32>
    %c0_1 = arith.constant 0 : index
    %c0_2 = arith.constant 0 : index
    %1 = vector.load %arg9[%c0_1, %c0_2] : memref<1x768xf32, #tpu.memory_space<vmem>>, vector<1x768xf32>
    %c0_3 = arith.constant 0 : index
    %c0_4 = arith.constant 0 : index
    %c0_5 = arith.constant 0 : index
    %2 = vector.load %arg2[%c0_3, %c0_4, %c0_5] : memref<9x8x4xf32, #tpu.memory_space<vmem>>, vector<1x8x4xf32>
    %3 = vector.shape_cast %2 : vector<1x8x4xf32> to vector<8x4xf32>
    %c0_6 = arith.constant 0 : index
    %c0_7 = arith.constant 0 : index
    %4 = vector.load %arg1[%c0_6, %c0_7] : memref<4x896xf32, #tpu.memory_space<vmem>>, vector<4x768xf32>
    %cst = arith.constant dense<0.000000e+00> : vector<8x768xf32>
    %5 = tpu.matmul %3, %4, %cst {dimension_numbers = #tpu.dot_dimension_numbers<[1], [0], [0], [1], [0, 0, 1, 1], [], []>} : vector<8x4xf32>, vector<4x768xf32>, vector<8x768xf32> -> vector<8x768xf32>
    %c1 = arith.constant 1 : index
    %c0_8 = arith.constant 0 : index
    %c0_9 = arith.constant 0 : index
    %6 = vector.load %arg2[%c1, %c0_8, %c0_9] : memref<9x8x4xf32, #tpu.memory_space<vmem>>, vector<1x8x4xf32>
    %7 = vector.shape_cast %6 : vector<1x8x4xf32> to vector<8x4xf32>
    %c0_10 = arith.constant 0 : index
    %c1_11 = arith.constant 1 : index
    %8 = vector.load %arg1[%c0_10, %c1_11] : memref<4x896xf32, #tpu.memory_space<vmem>>, vector<4x768xf32>
    %cst_12 = arith.constant dense<0.000000e+00> : vector<8x768xf32>
    %9 = tpu.matmul %7, %8, %cst_12 {dimension_numbers = #tpu.dot_dimension_numbers<[1], [0], [0], [1], [0, 0, 1, 1], [], []>} : vector<8x4xf32>, vector<4x768xf32>, vector<8x768xf32> -> vector<8x768xf32>
    %10 = arith.addf %5, %9 : vector<8x768xf32>
    %c2 = arith.constant 2 : index
    %c0_13 = arith.constant 0 : index
    %c0_14 = arith.constant 0 : index
    %11 = vector.load %arg2[%c2, %c0_13, %c0_14] : memref<9x8x4xf32, #tpu.memory_space<vmem>>, vector<1x8x4xf32>
    %12 = vector.shape_cast %11 : vector<1x8x4xf32> to vector<8x4xf32>
    %c0_15 = arith.constant 0 : index
    %c2_16 = arith.constant 2 : index
    %13 = vector.load %arg1[%c0_15, %c2_16] : memref<4x896xf32, #tpu.memory_space<vmem>>, vector<4x768xf32>
    %cst_17 = arith.constant dense<0.000000e+00> : vector<8x768xf32>
    %14 = tpu.matmul %12, %13, %cst_17 {dimension_numbers = #tpu.dot_dimension_numbers<[1], [0], [0], [1], [0, 0, 1, 1], [], []>} : vector<8x4xf32>, vector<4x768xf32>, vector<8x768xf32> -> vector<8x768xf32>
    %15 = arith.addf %10, %14 : vector<8x768xf32>
    %c3 = arith.constant 3 : index
    %c0_18 = arith.constant 0 : index
    %c0_19 = arith.constant 0 : index
    %16 = vector.load %arg2[%c3, %c0_18, %c0_19] : memref<9x8x4xf32, #tpu.memory_space<vmem>>, vector<1x8x4xf32>
    %17 = vector.shape_cast %16 : vector<1x8x4xf32> to vector<8x4xf32>
    %c0_20 = arith.constant 0 : index
    %c18 = arith.constant 18 : index
    %18 = vector.load %arg1[%c0_20, %c18] : memref<4x896xf32, #tpu.memory_space<vmem>>, vector<4x768xf32>
    %cst_21 = arith.constant dense<0.000000e+00> : vector<8x768xf32>
    %19 = tpu.matmul %17, %18, %cst_21 {dimension_numbers = #tpu.dot_dimension_numbers<[1], [0], [0], [1], [0, 0, 1, 1], [], []>} : vector<8x4xf32>, vector<4x768xf32>, vector<8x768xf32> -> vector<8x768xf32>
    %20 = arith.addf %15, %19 : vector<8x768xf32>
    %c4 = arith.constant 4 : index
    %c0_22 = arith.constant 0 : index
    %c0_23 = arith.constant 0 : index
    %21 = vector.load %arg2[%c4, %c0_22, %c0_23] : memref<9x8x4xf32, #tpu.memory_space<vmem>>, vector<1x8x4xf32>
    %22 = vector.shape_cast %21 : vector<1x8x4xf32> to vector<8x4xf32>
    %c0_24 = arith.constant 0 : index
    %c19 = arith.constant 19 : index
    %23 = vector.load %arg1[%c0_24, %c19] : memref<4x896xf32, #tpu.memory_space<vmem>>, vector<4x768xf32>
    %cst_25 = arith.constant dense<0.000000e+00> : vector<8x768xf32>
    %24 = tpu.matmul %22, %23, %cst_25 {dimension_numbers = #tpu.dot_dimension_numbers<[1], [0], [0], [1], [0, 0, 1, 1], [], []>} : vector<8x4xf32>, vector<4x768xf32>, vector<8x768xf32> -> vector<8x768xf32>
    %25 = arith.addf %20, %24 : vector<8x768xf32>
    %c5 = arith.constant 5 : index
    %c0_26 = arith.constant 0 : index
    %c0_27 = arith.constant 0 : index
    %26 = vector.load %arg2[%c5, %c0_26, %c0_27] : memref<9x8x4xf32, #tpu.memory_space<vmem>>, vector<1x8x4xf32>
    %27 = vector.shape_cast %26 : vector<1x8x4xf32> to vector<8x4xf32>
    %c0_28 = arith.constant 0 : index
    %c20 = arith.constant 20 : index
    %28 = vector.load %arg1[%c0_28, %c20] : memref<4x896xf32, #tpu.memory_space<vmem>>, vector<4x768xf32>
    %cst_29 = arith.constant dense<0.000000e+00> : vector<8x768xf32>
    %29 = tpu.matmul %27, %28, %cst_29 {dimension_numbers = #tpu.dot_dimension_numbers<[1], [0], [0], [1], [0, 0, 1, 1], [], []>} : vector<8x4xf32>, vector<4x768xf32>, vector<8x768xf32> -> vector<8x768xf32>
    %30 = arith.addf %25, %29 : vector<8x768xf32>
    %c6 = arith.constant 6 : index
    %c0_30 = arith.constant 0 : index
    %c0_31 = arith.constant 0 : index
    %31 = vector.load %arg2[%c6, %c0_30, %c0_31] : memref<9x8x4xf32, #tpu.memory_space<vmem>>, vector<1x8x4xf32>
    %32 = vector.shape_cast %31 : vector<1x8x4xf32> to vector<8x4xf32>
    %c0_32 = arith.constant 0 : index
    %c36 = arith.constant 36 : index
    %33 = vector.load %arg1[%c0_32, %c36] : memref<4x896xf32, #tpu.memory_space<vmem>>, vector<4x768xf32>
    %cst_33 = arith.constant dense<0.000000e+00> : vector<8x768xf32>
    %34 = tpu.matmul %32, %33, %cst_33 {dimension_numbers = #tpu.dot_dimension_numbers<[1], [0], [0], [1], [0, 0, 1, 1], [], []>} : vector<8x4xf32>, vector<4x768xf32>, vector<8x768xf32> -> vector<8x768xf32>
    %35 = arith.addf %30, %34 : vector<8x768xf32>
    %c7 = arith.constant 7 : index
    %c0_34 = arith.constant 0 : index
    %c0_35 = arith.constant 0 : index
    %36 = vector.load %arg2[%c7, %c0_34, %c0_35] : memref<9x8x4xf32, #tpu.memory_space<vmem>>, vector<1x8x4xf32>
    %37 = vector.shape_cast %36 : vector<1x8x4xf32> to vector<8x4xf32>
    %c0_36 = arith.constant 0 : index
    %c37 = arith.constant 37 : index
    %38 = vector.load %arg1[%c0_36, %c37] : memref<4x896xf32, #tpu.memory_space<vmem>>, vector<4x768xf32>
    %cst_37 = arith.constant dense<0.000000e+00> : vector<8x768xf32>
    %39 = tpu.matmul %37, %38, %cst_37 {dimension_numbers = #tpu.dot_dimension_numbers<[1], [0], [0], [1], [0, 0, 1, 1], [], []>} : vector<8x4xf32>, vector<4x768xf32>, vector<8x768xf32> -> vector<8x768xf32>
    %40 = arith.addf %35, %39 : vector<8x768xf32>
    %c8 = arith.constant 8 : index
    %c0_38 = arith.constant 0 : index
    %c0_39 = arith.constant 0 : index
    %41 = vector.load %arg2[%c8, %c0_38, %c0_39] : memref<9x8x4xf32, #tpu.memory_space<vmem>>, vector<1x8x4xf32>
    %42 = vector.shape_cast %41 : vector<1x8x4xf32> to vector<8x4xf32>
    %c0_40 = arith.constant 0 : index
    %c38 = arith.constant 38 : index
    %43 = vector.load %arg1[%c0_40, %c38] : memref<4x896xf32, #tpu.memory_space<vmem>>, vector<4x768xf32>
    %cst_41 = arith.constant dense<0.000000e+00> : vector<8x768xf32>
    %44 = tpu.matmul %42, %43, %cst_41 {dimension_numbers = #tpu.dot_dimension_numbers<[1], [0], [0], [1], [0, 0, 1, 1], [], []>} : vector<8x4xf32>, vector<4x768xf32>, vector<8x768xf32> -> vector<8x768xf32>
    %45 = arith.addf %40, %44 : vector<8x768xf32>
    %46 = vector.broadcast %0 : vector<1x768xf32> to vector<8x768xf32>
    %47 = arith.mulf %45, %46 : vector<8x768xf32>
    %cst_42 = arith.constant dense<0.000000e+00> : vector<8xf32>
    %48 = vector.multi_reduction <add>, %47, %cst_42 [1] : vector<8x768xf32> to vector<8xf32>
    %49 = vector.shape_cast %48 : vector<8xf32> to vector<8x1xf32>
    %cst_43 = arith.constant 0.001953125 : f32
    %50 = vector.broadcast %cst_43 : f32 to vector<8x1xf32>
    %51 = arith.mulf %49, %50 : vector<8x1xf32>
    %52 = arith.mulf %47, %47 : vector<8x768xf32>
    %cst_44 = arith.constant dense<0.000000e+00> : vector<8xf32>
    %53 = vector.multi_reduction <add>, %52, %cst_44 [1] : vector<8x768xf32> to vector<8xf32>
    %54 = vector.shape_cast %53 : vector<8xf32> to vector<8x1xf32>
    %cst_45 = arith.constant 0.001953125 : f32
    %55 = vector.broadcast %cst_45 : f32 to vector<8x1xf32>
    %56 = arith.mulf %54, %55 : vector<8x1xf32>
    %57 = arith.mulf %51, %51 : vector<8x1xf32>
    %58 = arith.subf %56, %57 : vector<8x1xf32>
    %cst_46 = arith.constant 0.000000e+00 : f32
    %59 = vector.broadcast %cst_46 : f32 to vector<8x1xf32>
    %60 = arith.maximumf %58, %59 : vector<8x1xf32>
    %c0_47 = arith.constant 0 : index
    %c0_48 = arith.constant 0 : index
    %61 = vector.load %arg3[%c0_47, %c0_48] : memref<8x1xf32, #tpu.memory_space<vmem>>, vector<8x1xf32>
    %cst_49 = arith.constant 9.99999974E-6 : f32
    %62 = vector.broadcast %cst_49 : f32 to vector<8x1xf32>
    %63 = arith.addf %60, %62 : vector<8x1xf32>
    %64 = math.rsqrt %63 : vector<8x1xf32>
    %65 = arith.mulf %61, %64 : vector<8x1xf32>
    %c0_50 = arith.constant 0 : index
    %c0_51 = arith.constant 0 : index
    %66 = vector.load %arg4[%c0_50, %c0_51] : memref<8x1xf32, #tpu.memory_space<vmem>>, vector<8x1xf32>
    %67 = arith.mulf %51, %65 : vector<8x1xf32>
    %68 = arith.subf %66, %67 : vector<8x1xf32>
    %69 = vector.broadcast %65 : vector<8x1xf32> to vector<8x768xf32>
    %70 = arith.mulf %45, %69 : vector<8x768xf32>
    %71 = vector.broadcast %68 : vector<8x1xf32> to vector<8x768xf32>
    %72 = arith.addf %70, %71 : vector<8x768xf32>
    %cst_52 = arith.constant 0.000000e+00 : f32
    %73 = vector.broadcast %cst_52 : f32 to vector<8x768xf32>
    %74 = arith.maximumf %72, %73 : vector<8x768xf32>
    %cst_53 = arith.constant 0.000000e+00 : f32
    %75 = vector.broadcast %cst_53 : f32 to vector<8x128xf32>
    %c0_54 = arith.constant 0 : index
    %c768 = arith.constant 768 : index
    %76 = vector.load %arg11[%c0_54, %c768] : memref<8x896xf32, #tpu.memory_space<vmem>>, vector<8x128xf32>
    tpu.vector_store %arg11[%c0_54, %c768], %75 {strides = array<i32>} : memref<8x896xf32, #tpu.memory_space<vmem>>, vector<8x128xf32>,
    %77 = vector.broadcast %0 : vector<1x768xf32> to vector<8x768xf32>
    %78 = arith.mulf %74, %77 : vector<8x768xf32>
    %c0_55 = arith.constant 0 : index
    %c0_56 = arith.constant 0 : index
    %79 = vector.load %arg11[%c0_55, %c0_56] : memref<8x896xf32, #tpu.memory_space<vmem>>, vector<8x768xf32>
    tpu.vector_store %arg11[%c0_55, %c0_56], %78 {strides = array<i32>} : memref<8x896xf32, #tpu.memory_space<vmem>>, vector<8x768xf32>,
    %c0_57 = arith.constant 0 : index
    %c0_58 = arith.constant 0 : index
    %c0_59 = arith.constant 0 : index
    %80 = vector.load %arg5[%c0_57, %c0_58, %c0_59] : memref<9x8x8xf32, #tpu.memory_space<vmem>>, vector<1x8x8xf32>
    %81 = vector.shape_cast %80 : vector<1x8x8xf32> to vector<8x8xf32>
    %c0_60 = arith.constant 0 : index
    %c0_61 = arith.constant 0 : index
    %82 = vector.load %arg11[%c0_60, %c0_61] : memref<8x896xf32, #tpu.memory_space<vmem>>, vector<8x768xf32>
    %cst_62 = arith.constant dense<0.000000e+00> : vector<8x768xf32>
    %83 = tpu.matmul %81, %82, %cst_62 {dimension_numbers = #tpu.dot_dimension_numbers<[1], [0], [0], [1], [0, 0, 1, 1], [], []>} : vector<8x8xf32>, vector<8x768xf32>, vector<8x768xf32> -> vector<8x768xf32>
    %c1_63 = arith.constant 1 : index
    %c0_64 = arith.constant 0 : index
    %c0_65 = arith.constant 0 : index
    %84 = vector.load %arg5[%c1_63, %c0_64, %c0_65] : memref<9x8x8xf32, #tpu.memory_space<vmem>>, vector<1x8x8xf32>
    %85 = vector.shape_cast %84 : vector<1x8x8xf32> to vector<8x8xf32>
    %c0_66 = arith.constant 0 : index
    %c1_67 = arith.constant 1 : index
    %86 = vector.load %arg11[%c0_66, %c1_67] : memref<8x896xf32, #tpu.memory_space<vmem>>, vector<8x768xf32>
    %cst_68 = arith.constant dense<0.000000e+00> : vector<8x768xf32>
    %87 = tpu.matmul %85, %86, %cst_68 {dimension_numbers = #tpu.dot_dimension_numbers<[1], [0], [0], [1], [0, 0, 1, 1], [], []>} : vector<8x8xf32>, vector<8x768xf32>, vector<8x768xf32> -> vector<8x768xf32>
    %88 = arith.addf %83, %87 : vector<8x768xf32>
    %c2_69 = arith.constant 2 : index
    %c0_70 = arith.constant 0 : index
    %c0_71 = arith.constant 0 : index
    %89 = vector.load %arg5[%c2_69, %c0_70, %c0_71] : memref<9x8x8xf32, #tpu.memory_space<vmem>>, vector<1x8x8xf32>
    %90 = vector.shape_cast %89 : vector<1x8x8xf32> to vector<8x8xf32>
    %c0_72 = arith.constant 0 : index
    %c2_73 = arith.constant 2 : index
    %91 = vector.load %arg11[%c0_72, %c2_73] : memref<8x896xf32, #tpu.memory_space<vmem>>, vector<8x768xf32>
    %cst_74 = arith.constant dense<0.000000e+00> : vector<8x768xf32>
    %92 = tpu.matmul %90, %91, %cst_74 {dimension_numbers = #tpu.dot_dimension_numbers<[1], [0], [0], [1], [0, 0, 1, 1], [], []>} : vector<8x8xf32>, vector<8x768xf32>, vector<8x768xf32> -> vector<8x768xf32>
    %93 = arith.addf %88, %92 : vector<8x768xf32>
    %c3_75 = arith.constant 3 : index
    %c0_76 = arith.constant 0 : index
    %c0_77 = arith.constant 0 : index
    %94 = vector.load %arg5[%c3_75, %c0_76, %c0_77] : memref<9x8x8xf32, #tpu.memory_space<vmem>>, vector<1x8x8xf32>
    %95 = vector.shape_cast %94 : vector<1x8x8xf32> to vector<8x8xf32>
    %c0_78 = arith.constant 0 : index
    %c18_79 = arith.constant 18 : index
    %96 = vector.load %arg11[%c0_78, %c18_79] : memref<8x896xf32, #tpu.memory_space<vmem>>, vector<8x768xf32>
    %cst_80 = arith.constant dense<0.000000e+00> : vector<8x768xf32>
    %97 = tpu.matmul %95, %96, %cst_80 {dimension_numbers = #tpu.dot_dimension_numbers<[1], [0], [0], [1], [0, 0, 1, 1], [], []>} : vector<8x8xf32>, vector<8x768xf32>, vector<8x768xf32> -> vector<8x768xf32>
    %98 = arith.addf %93, %97 : vector<8x768xf32>
    %c4_81 = arith.constant 4 : index
    %c0_82 = arith.constant 0 : index
    %c0_83 = arith.constant 0 : index
    %99 = vector.load %arg5[%c4_81, %c0_82, %c0_83] : memref<9x8x8xf32, #tpu.memory_space<vmem>>, vector<1x8x8xf32>
    %100 = vector.shape_cast %99 : vector<1x8x8xf32> to vector<8x8xf32>
    %c0_84 = arith.constant 0 : index
    %c19_85 = arith.constant 19 : index
    %101 = vector.load %arg11[%c0_84, %c19_85] : memref<8x896xf32, #tpu.memory_space<vmem>>, vector<8x768xf32>
    %cst_86 = arith.constant dense<0.000000e+00> : vector<8x768xf32>
    %102 = tpu.matmul %100, %101, %cst_86 {dimension_numbers = #tpu.dot_dimension_numbers<[1], [0], [0], [1], [0, 0, 1, 1], [], []>} : vector<8x8xf32>, vector<8x768xf32>, vector<8x768xf32> -> vector<8x768xf32>
    %103 = arith.addf %98, %102 : vector<8x768xf32>
    %c5_87 = arith.constant 5 : index
    %c0_88 = arith.constant 0 : index
    %c0_89 = arith.constant 0 : index
    %104 = vector.load %arg5[%c5_87, %c0_88, %c0_89] : memref<9x8x8xf32, #tpu.memory_space<vmem>>, vector<1x8x8xf32>
    %105 = vector.shape_cast %104 : vector<1x8x8xf32> to vector<8x8xf32>
    %c0_90 = arith.constant 0 : index
    %c20_91 = arith.constant 20 : index
    %106 = vector.load %arg11[%c0_90, %c20_91] : memref<8x896xf32, #tpu.memory_space<vmem>>, vector<8x768xf32>
    %cst_92 = arith.constant dense<0.000000e+00> : vector<8x768xf32>
    %107 = tpu.matmul %105, %106, %cst_92 {dimension_numbers = #tpu.dot_dimension_numbers<[1], [0], [0], [1], [0, 0, 1, 1], [], []>} : vector<8x8xf32>, vector<8x768xf32>, vector<8x768xf32> -> vector<8x768xf32>
    %108 = arith.addf %103, %107 : vector<8x768xf32>
    %c6_93 = arith.constant 6 : index
    %c0_94 = arith.constant 0 : index
    %c0_95 = arith.constant 0 : index
    %109 = vector.load %arg5[%c6_93, %c0_94, %c0_95] : memref<9x8x8xf32, #tpu.memory_space<vmem>>, vector<1x8x8xf32>
    %110 = vector.shape_cast %109 : vector<1x8x8xf32> to vector<8x8xf32>
    %c0_96 = arith.constant 0 : index
    %c36_97 = arith.constant 36 : index
    %111 = vector.load %arg11[%c0_96, %c36_97] : memref<8x896xf32, #tpu.memory_space<vmem>>, vector<8x768xf32>
    %cst_98 = arith.constant dense<0.000000e+00> : vector<8x768xf32>
    %112 = tpu.matmul %110, %111, %cst_98 {dimension_numbers = #tpu.dot_dimension_numbers<[1], [0], [0], [1], [0, 0, 1, 1], [], []>} : vector<8x8xf32>, vector<8x768xf32>, vector<8x768xf32> -> vector<8x768xf32>
    %113 = arith.addf %108, %112 : vector<8x768xf32>
    %c7_99 = arith.constant 7 : index
    %c0_100 = arith.constant 0 : index
    %c0_101 = arith.constant 0 : index
    %114 = vector.load %arg5[%c7_99, %c0_100, %c0_101] : memref<9x8x8xf32, #tpu.memory_space<vmem>>, vector<1x8x8xf32>
    %115 = vector.shape_cast %114 : vector<1x8x8xf32> to vector<8x8xf32>
    %c0_102 = arith.constant 0 : index
    %c37_103 = arith.constant 37 : index
    %116 = vector.load %arg11[%c0_102, %c37_103] : memref<8x896xf32, #tpu.memory_space<vmem>>, vector<8x768xf32>
    %cst_104 = arith.constant dense<0.000000e+00> : vector<8x768xf32>
    %117 = tpu.matmul %115, %116, %cst_104 {dimension_numbers = #tpu.dot_dimension_numbers<[1], [0], [0], [1], [0, 0, 1, 1], [], []>} : vector<8x8xf32>, vector<8x768xf32>, vector<8x768xf32> -> vector<8x768xf32>
    %118 = arith.addf %113, %117 : vector<8x768xf32>
    %c8_105 = arith.constant 8 : index
    %c0_106 = arith.constant 0 : index
    %c0_107 = arith.constant 0 : index
    %119 = vector.load %arg5[%c8_105, %c0_106, %c0_107] : memref<9x8x8xf32, #tpu.memory_space<vmem>>, vector<1x8x8xf32>
    %120 = vector.shape_cast %119 : vector<1x8x8xf32> to vector<8x8xf32>
    %c0_108 = arith.constant 0 : index
    %c38_109 = arith.constant 38 : index
    %121 = vector.load %arg11[%c0_108, %c38_109] : memref<8x896xf32, #tpu.memory_space<vmem>>, vector<8x768xf32>
    %cst_110 = arith.constant dense<0.000000e+00> : vector<8x768xf32>
    %122 = tpu.matmul %120, %121, %cst_110 {dimension_numbers = #tpu.dot_dimension_numbers<[1], [0], [0], [1], [0, 0, 1, 1], [], []>} : vector<8x8xf32>, vector<8x768xf32>, vector<8x768xf32> -> vector<8x768xf32>
    %123 = arith.addf %118, %122 : vector<8x768xf32>
    %124 = vector.broadcast %1 : vector<1x768xf32> to vector<8x768xf32>
    %125 = arith.mulf %123, %124 : vector<8x768xf32>
    %cst_111 = arith.constant dense<0.000000e+00> : vector<8xf32>
    %126 = vector.multi_reduction <add>, %125, %cst_111 [1] : vector<8x768xf32> to vector<8xf32>
    %127 = vector.shape_cast %126 : vector<8xf32> to vector<8x1xf32>
    %cst_112 = arith.constant 0.001953125 : f32
    %128 = vector.broadcast %cst_112 : f32 to vector<8x1xf32>
    %129 = arith.mulf %127, %128 : vector<8x1xf32>
    %130 = arith.mulf %125, %125 : vector<8x768xf32>
    %cst_113 = arith.constant dense<0.000000e+00> : vector<8xf32>
    %131 = vector.multi_reduction <add>, %130, %cst_113 [1] : vector<8x768xf32> to vector<8xf32>
    %132 = vector.shape_cast %131 : vector<8xf32> to vector<8x1xf32>
    %cst_114 = arith.constant 0.001953125 : f32
    %133 = vector.broadcast %cst_114 : f32 to vector<8x1xf32>
    %134 = arith.mulf %132, %133 : vector<8x1xf32>
    %135 = arith.mulf %129, %129 : vector<8x1xf32>
    %136 = arith.subf %134, %135 : vector<8x1xf32>
    %cst_115 = arith.constant 0.000000e+00 : f32
    %137 = vector.broadcast %cst_115 : f32 to vector<8x1xf32>
    %138 = arith.maximumf %136, %137 : vector<8x1xf32>
    %c0_116 = arith.constant 0 : index
    %c0_117 = arith.constant 0 : index
    %139 = vector.load %arg6[%c0_116, %c0_117] : memref<8x1xf32, #tpu.memory_space<vmem>>, vector<8x1xf32>
    %cst_118 = arith.constant 9.99999974E-6 : f32
    %140 = vector.broadcast %cst_118 : f32 to vector<8x1xf32>
    %141 = arith.addf %138, %140 : vector<8x1xf32>
    %142 = math.rsqrt %141 : vector<8x1xf32>
    %143 = arith.mulf %139, %142 : vector<8x1xf32>
    %c0_119 = arith.constant 0 : index
    %c0_120 = arith.constant 0 : index
    %144 = vector.load %arg7[%c0_119, %c0_120] : memref<8x1xf32, #tpu.memory_space<vmem>>, vector<8x1xf32>
    %145 = arith.mulf %129, %143 : vector<8x1xf32>
    %146 = arith.subf %144, %145 : vector<8x1xf32>
    %147 = vector.broadcast %143 : vector<8x1xf32> to vector<8x768xf32>
    %148 = arith.mulf %123, %147 : vector<8x768xf32>
    %149 = vector.broadcast %146 : vector<8x1xf32> to vector<8x768xf32>
    %150 = arith.addf %148, %149 : vector<8x768xf32>
    %cst_121 = arith.constant 0.000000e+00 : f32
    %151 = vector.broadcast %cst_121 : f32 to vector<8x768xf32>
    %152 = arith.maximumf %150, %151 : vector<8x768xf32>
    %c0_122 = arith.constant 0 : index
    %c0_123 = arith.constant 0 : index
    %153 = vector.load %arg10[%c0_122, %c0_123] : memref<8x768xf32, #tpu.memory_space<vmem>>, vector<8x768xf32>
    tpu.vector_store %arg10[%c0_122, %c0_123], %152 {strides = array<i32>} : memref<8x768xf32, #tpu.memory_space<vmem>>, vector<8x768xf32>,
    return
  }
  func.func @transform_0(%arg0: i32) -> (i32, i32) {
    %c0_i32 = arith.constant 0 : i32
    %c0_i32_0 = arith.constant 0 : i32
    %c0_i32_1 = arith.constant 0 : i32
    return %c0_i32, %c0_i32_0 : i32, i32
  }
  func.func @transform_1(%arg0: i32) -> (i32, i32, i32) {
    %c0_i32 = arith.constant 0 : i32
    %c0_i32_0 = arith.constant 0 : i32
    %c0_i32_1 = arith.constant 0 : i32
    %c0_i32_2 = arith.constant 0 : i32
    return %c0_i32, %c0_i32_0, %c0_i32_1 : i32, i32, i32
  }
  func.func @transform_2(%arg0: i32) -> (i32, i32) {
    %c0_i32 = arith.constant 0 : i32
    %c0_i32_0 = arith.constant 0 : i32
    %c0_i32_1 = arith.constant 0 : i32
    return %c0_i32, %c0_i32_0 : i32, i32
  }
  func.func @transform_3(%arg0: i32) -> (i32, i32) {
    %c0_i32 = arith.constant 0 : i32
    %c0_i32_0 = arith.constant 0 : i32
    %c0_i32_1 = arith.constant 0 : i32
    return %c0_i32, %c0_i32_0 : i32, i32
  }
  func.func @transform_4(%arg0: i32) -> (i32, i32, i32) {
    %c0_i32 = arith.constant 0 : i32
    %c0_i32_0 = arith.constant 0 : i32
    %c0_i32_1 = arith.constant 0 : i32
    %c0_i32_2 = arith.constant 0 : i32
    return %c0_i32, %c0_i32_0, %c0_i32_1 : i32, i32, i32
  }
  func.func @transform_5(%arg0: i32) -> (i32, i32) {
    %c0_i32 = arith.constant 0 : i32
    %c0_i32_0 = arith.constant 0 : i32
    %c0_i32_1 = arith.constant 0 : i32
    return %c0_i32, %c0_i32_0 : i32, i32
  }
  func.func @transform_6(%arg0: i32) -> (i32, i32) {
    %c0_i32 = arith.constant 0 : i32
    %c0_i32_0 = arith.constant 0 : i32
    %c0_i32_1 = arith.constant 0 : i32
    return %c0_i32, %c0_i32_0 : i32, i32
  }
  func.func @transform_7(%arg0: i32) -> (i32, i32) {
    %c0_i32 = arith.constant 0 : i32
    %c0_i32_0 = arith.constant 0 : i32
    %c0_i32_1 = arith.constant 0 : i32
    return %c0_i32, %c0_i32_0 : i32, i32
  }
  func.func @transform_8(%arg0: i32) -> (i32, i32) {
    %c0_i32 = arith.constant 0 : i32
    %c0_i32_0 = arith.constant 0 : i32
    %c0_i32_1 = arith.constant 0 : i32
    return %c0_i32, %c0_i32_0 : i32, i32
  }
  func.func @transform_9(%arg0: i32) -> (i32, i32) {
    %c0_i32 = arith.constant 0 : i32
    %c0_i32_0 = arith.constant 0 : i32
    %c0_i32_1 = arith.constant 0 : i32
    return %c0_i32, %c0_i32_0 : i32, i32
  }
}

</mosaic_0001>

<bundles_post_ra>
// kernel: double_conv.1
= control target key start
LH: loop header
LB: loop body
LE: loop exit
PB: predicated region body
PF: predicated region fallthrough
CT: control target
= control target key end

     0   :  { %v5100_v2 = vmov 0.0   ;;  %s5101_s13 = smov 127   ;;  %s5102_s18 = smov 126   ;;  %vm65_vm0 = vcmask 1039360   ;;  %vm76_vm1 = vcmask 1043456   ;;  %vm72_vm2 = vcmask 31744   ;;  %s5894_s0 = inlined_call_operand.vmem [shape: f32[4,896], index: 0, kind: input, shape index: {}]   ;;  %s5895_s1 = inlined_call_operand.vmem [shape: f32[9,8,4], index: 1, kind: input, shape index: {}]   ;;  %s5896_s7 = inlined_call_operand.vmem [shape: f32[1,768], index: 7, kind: input, shape index: {}]   ;;  %s5897_s2 = inlined_call_operand.vmem [shape: f32[8,1], index: 2, kind: input, shape index: {}]   ;;  %s5898_s3 = inlined_call_operand.vmem [shape: f32[8,1], index: 3, kind: input, shape index: {}]   ;;  %s5899_s4 = inlined_call_operand.vmem [shape: f32[9,8,8], index: 4, kind: input, shape index: {}]   ;;  %s5900_s8 = inlined_call_operand.vmem [shape: f32[1,768], index: 8, kind: input, shape index: {}]   ;;  %s5901_s5 = inlined_call_operand.vmem [shape: f32[8,1], index: 5, kind: input, shape index: {}]   ;;  %s5902_s6 = inlined_call_operand.vmem [shape: f32[8,1], index: 6, kind: input, shape index: {}]   ;;  %s5903_s9 = inlined_call_operand.vmem [shape: f32[8,768], index: 9, kind: output, shape index: {}]  }
   0x1   :  { %v5163_v0 = vld [vmem:[%s5894_s0 + $0x8] sm:$0xff]  ;;  %v5168_v1 = vld [vmem:[%s5894_s0] sm:$0xff]  ;;  %153 = vmatprep.mubr.f32.mxu0 %v5100_v2  ;;  %2639 = vmatprep.mubr.f32.mxu1 %v5100_v2  ;;  %v5187_v5 = vld [vmem:[%s5894_s0 + $0x10] sm:$0xff]  ;;  %s5103_s21 = smov 110   ;;  %s5104_s24 = smov 109   ;;  %vm563_vm3 = vcmask 1031168  }
   0x2   :  { %55 = vrot.lane.b32.xlu0 %v5163_v0, %s5101_s13  ;;  %v5176_v3 = vcombine.high %v5163_v0, %v5163_v0  ;;  %51 = vrot.lane.b32.xlu1 %v5168_v1, %s5101_s13  ;;  %v5182_v4 = vcombine.high %v5168_v1, %v5168_v1  ;;  %v5195_v6 = vcombine.high %v5187_v5, %v5187_v5  ;;  %v43_v7 = vld [vmem:[%s5894_s0 + $0x18] sm:$0xf]  ;;  %s5105_s27 = smov 108   ;;  %s5106_s30 = smov 92   ;;  %v4861_v21 = vld [vmem:[%s5895_s1 + $0x8] sm:$0xff]  ;;  %vm831_vm4 = vcmask 900096  }
   0x3   :  { %v541_v8 = vld [vmem:[%s5894_s0 + $0x18] sm:$0xf]  ;;  %s5107_s12 = smov 91   ;;  %s5108_s16 = smov 90   ;;  %v34_v32 = vld [vmem:[%s5895_s1] sm:$0xff]  ;;  %v4880_v42 = vld [vmem:[%s5895_s1 + $0x10] sm:$0xff] }
   0x4   :  { %v809_v9 = vld [vmem:[%s5894_s0 + $0x18] sm:$0xf]  ;;  %vm1099_vm5 = vcmask 891904   ;;  %vm1367_vm6 = vcmask 883712   ;;  %vm1635_vm7 = vcmask 752640   ;;  %vm1903_vm8 = vcmask 744448  }
   0x5   :  { %v1077_v10 = vld [vmem:[%s5894_s0 + $0x18] sm:$0xf]  ;;  %vm2171_vm9 = vcmask 736256   ;;  %vm2571_vm10 = vcmask 64512  }
   0x6   :  { %57 = vrot.lane.b32.xlu1 %v5176_v3, %s5101_s13  ;;  %53 = vrot.lane.b32.xlu0 %v5182_v4, %s5101_s13  ;;  %v1345_v11 = vld [vmem:[%s5894_s0 + $0x18] sm:$0xf] }
   0x7   :  { %v1613_v12 = vld [vmem:[%s5894_s0 + $0x18] sm:$0xf] }
   0x8   :  { %v1881_v13 = vld [vmem:[%s5894_s0 + $0x18] sm:$0xf] }
   0x9   :  { %v2149_v14 = vld [vmem:[%s5894_s0 + $0x18] sm:$0xf] }
   0xa   :  { %61 = vrot.lane.b32.xlu1 %v5195_v6, %s5101_s13  ;;  %59 = vrot.lane.b32.xlu0 %v5187_v5, %s5101_s13  ;;  %v4890_v55 = vld [vmem:[%s5895_s1 + $0x18] sm:$0xff] }
   0xe   :  { %551 = vrot.lane.b32.xlu1 %v5182_v4, %s5102_s18  ;;  %63 = vrot.lane.b32.xlu0 %v43_v7, %s5101_s13 }
  0x12   :  { %549 = vrot.lane.b32.xlu1 %v5168_v1, %s5102_s18  ;;  %553 = vrot.lane.b32.xlu0 %v5163_v0, %s5102_s18 }
  0x16   :  { %557 = vrot.lane.b32.xlu1 %v5187_v5, %s5102_s18  ;;  %555 = vrot.lane.b32.xlu0 %v5176_v3, %s5102_s18 }
  0x1a   :  { %561 = vrot.lane.b32.xlu1 %v541_v8, %s5102_s18  ;;  %559 = vrot.lane.b32.xlu0 %v5195_v6, %s5102_s18 }
  0x1e   :  { %821 = vrot.lane.b32.xlu1 %v5163_v0, %s5103_s21  ;;  %819 = vrot.lane.b32.xlu0 %v5182_v4, %s5103_s21 }
  0x22   :  { %823 = vrot.lane.b32.xlu1 %v5176_v3, %s5103_s21  ;;  %817 = vrot.lane.b32.xlu0 %v5168_v1, %s5103_s21 }
  0x26   :  { %827 = vrot.lane.b32.xlu1 %v5195_v6, %s5103_s21  ;;  %825 = vrot.lane.b32.xlu0 %v5187_v5, %s5103_s21 }
  0x2a   :  { %1087 = vrot.lane.b32.xlu1 %v5182_v4, %s5104_s24  ;;  %829 = vrot.lane.b32.xlu0 %v809_v9, %s5103_s21 }
  0x2e   :  { %1085 = vrot.lane.b32.xlu1 %v5168_v1, %s5104_s24  ;;  %1089 = vrot.lane.b32.xlu0 %v5163_v0, %s5104_s24 }
  0x32   :  { %1093 = vrot.lane.b32.xlu1 %v5187_v5, %s5104_s24  ;;  %1091 = vrot.lane.b32.xlu0 %v5176_v3, %s5104_s24 }
  0x36   :  { %1097 = vrot.lane.b32.xlu1 %v1077_v10, %s5104_s24  ;;  %1095 = vrot.lane.b32.xlu0 %v5195_v6, %s5104_s24 }
  0x3a   :  { %1357 = vrot.lane.b32.xlu1 %v5163_v0, %s5105_s27  ;;  %1355 = vrot.lane.b32.xlu0 %v5182_v4, %s5105_s27 }
  0x3e   :  { %1359 = vrot.lane.b32.xlu1 %v5176_v3, %s5105_s27  ;;  %1353 = vrot.lane.b32.xlu0 %v5168_v1, %s5105_s27 }
  0x42   :  { %1363 = vrot.lane.b32.xlu1 %v5195_v6, %s5105_s27  ;;  %1361 = vrot.lane.b32.xlu0 %v5187_v5, %s5105_s27 }
  0x46   :  { %1623 = vrot.lane.b32.xlu1 %v5182_v4, %s5106_s30  ;;  %1365 = vrot.lane.b32.xlu0 %v1345_v11, %s5105_s27 }
  0x4a   :  { %1621 = vrot.lane.b32.xlu1 %v5168_v1, %s5106_s30  ;;  %1625 = vrot.lane.b32.xlu0 %v5163_v0, %s5106_s30 }
  0x4e   :  { %1629 = vrot.lane.b32.xlu1 %v5187_v5, %s5106_s30  ;;  %1627 = vrot.lane.b32.xlu0 %v5176_v3, %s5106_s30 }
  0x52   :  { %1633 = vrot.lane.b32.xlu1 %v1613_v12, %s5106_s30  ;;  %1631 = vrot.lane.b32.xlu0 %v5195_v6, %s5106_s30 }
  0x56   :  { %1893 = vrot.lane.b32.xlu1 %v5163_v0, %s5107_s12  ;;  %1891 = vrot.lane.b32.xlu0 %v5182_v4, %s5107_s12 }
  0x5a   :  { %1895 = vrot.lane.b32.xlu1 %v5176_v3, %s5107_s12  ;;  %1889 = vrot.lane.b32.xlu0 %v5168_v1, %s5107_s12 }
  0x5e   :  { %1899 = vrot.lane.b32.xlu1 %v5195_v6, %s5107_s12  ;;  %1897 = vrot.lane.b32.xlu0 %v5187_v5, %s5107_s12 }
  0x62   :  { %2159 = vrot.lane.b32.xlu1 %v5182_v4, %s5108_s16  ;;  %1901 = vrot.lane.b32.xlu0 %v1881_v13, %s5107_s12 }
  0x66   :  { %2157 = vrot.lane.b32.xlu1 %v5168_v1, %s5108_s16  ;;  %2161 = vrot.lane.b32.xlu0 %v5163_v0, %s5108_s16 }
  0x6a   :  { %2165 = vrot.lane.b32.xlu1 %v5187_v5, %s5108_s16  ;;  %2163 = vrot.lane.b32.xlu0 %v5176_v3, %s5108_s16 }
  0x6e   :  { %2169 = vrot.lane.b32.xlu1 %v2149_v14, %s5108_s16  ;;  %2167 = vrot.lane.b32.xlu0 %v5195_v6, %s5108_s16 }
  0x74   :  { %v56_v15 = vpop.permute.xlu0 %55  ;;  %v52_v16 = vpop.permute.xlu1 %51 }
  0x78   :  { %v58_v17 = vpop.permute.xlu1 %57  ;;  %v54_v18 = vpop.permute.xlu0 %53 }
  0x79   :  { %v67_v19 = vsel %vm65_vm0, %v54_v18, %v56_v15  ;;  %v66_v20 = vsel %vm65_vm0, %v52_v16, %v54_v18  ;;  %v68_v25 = vsel %vm65_vm0, %v56_v15, %v58_v17  ;;  %v4910_v18 = vld [vmem:[%s5895_s1 + $0x28] sm:$0xff] }
  0x7a   :  { %4862 = vmatprep.subr.msk.mxu0 %vm76_vm1, %v67_v19 }
  0x7b   :  { %4863 = vmatpush1.msk.msra.mxu0 %vm76_vm1, %v66_v20 }
  0x7c   :  { %v62_v22 = vpop.permute.xlu1 %61  ;;  %4864 = vmatmul.mubr.msk.f32.vlgmr.msra.gmra.mrb[0].mxu0 %vm72_vm2, %v4861_v21  ;;  %v60_v23 = vpop.permute.xlu0 %59 }
  0x7d   :  { %v69_v24 = vsel %vm65_vm0, %v58_v17, %v60_v23  ;;  %224 = vmatprep.mubr.f32.mxu0 %v5100_v2  ;;  %v70_v29 = vsel %vm65_vm0, %v60_v23, %v62_v22 }
  0x7e   :  { %4865 = vmatprep.subr.msk.mxu0 %vm76_vm1, %v69_v24 }
  0x7f   :  { %4866 = vmatpush1.msk.msra.mxu0 %vm76_vm1, %v68_v25 }
  0x80   :  { %v552_v26 = vpop.permute.xlu1 %551  ;;  %4867 = vmatmul.mubr.msk.f32.vlgmr.msra.gmra.mrb[2].mxu0 %vm72_vm2, %v4861_v21  ;;  %v64_v27 = vpop.permute.xlu0 %63 }
  0x81   :  { %v71_v28 = vsel %vm65_vm0, %v62_v22, %v64_v27  ;;  %295 = vmatprep.mubr.f32.mxu0 %v5100_v2 }
  0x82   :  { %4868 = vmatprep.subr.msk.mxu0 %vm76_vm1, %v71_v28 }
  0x83   :  { %4869 = vmatpush1.msk.msra.mxu0 %vm76_vm1, %v70_v29 }
  0x84   :  { %v550_v30 = vpop.permute.xlu1 %549  ;;  %4870 = vmatmul.mubr.msk.f32.vlgmr.msra.gmra.mrb[4].mxu0 %vm72_vm2, %v4861_v21  ;;  %v554_v31 = vpop.permute.xlu0 %553  ;;  %4871 = vmatprep.subr.msk.mxu0 %vm76_vm1, %v5182_v4 }
  0x85   :  { %4872 = vmatpush1.msk.msra.mxu0 %vm76_vm1, %v5168_v1  ;;  %387 = vmatprep.mubr.f32.mxu0 %v5100_v2  ;;  %v565_v37 = vsel %vm563_vm3, %v552_v26, %v554_v31  ;;  %v564_v38 = vsel %vm563_vm3, %v550_v30, %v552_v26 }
  0x86   :  { %4874 = vmatprep.subr.msk.mxu0 %vm76_vm1, %v5176_v3 }
  0x88   :  { %v558_v33 = vpop.permute.xlu1 %557  ;;  %v556_v34 = vpop.permute.xlu0 %555  ;;  %4873 = vmatmul.mubr.msk.f32.vlgmr.msra.gmra.mrb[0].mxu0 %vm72_vm2, %v34_v32 }
  0x89   :  { %4875 = vmatpush1.msk.msra.mxu0 %vm76_vm1, %v5163_v0  ;;  %458 = vmatprep.mubr.f32.mxu0 %v5100_v2  ;;  %v567_v41 = vsel %vm563_vm3, %v556_v34, %v558_v33  ;;  %v566_v43 = vsel %vm563_vm3, %v554_v31, %v556_v34  ;;  %v4920_v31 = vld [vmem:[%s5895_s1 + $0x30] sm:$0xff] }
  0x8a   :  { %4877 = vmatprep.subr.msk.mxu0 %vm76_vm1, %v5195_v6 }
  0x8c   :  { %v562_v35 = vpop.permute.xlu1 %561  ;;  %v560_v36 = vpop.permute.xlu0 %559  ;;  %4876 = vmatmul.mubr.msk.f32.vlgmr.msra.gmra.mrb[2].mxu0 %vm72_vm2, %v34_v32 }
  0x8d   :  { %4878 = vmatpush1.msk.msra.mxu0 %vm76_vm1, %v5187_v5  ;;  %529 = vmatprep.mubr.f32.mxu0 %v5100_v2  ;;  %v569_v46 = vsel %vm563_vm3, %v560_v36, %v562_v35  ;;  %v568_v47 = vsel %vm563_vm3, %v558_v33, %v560_v36  ;;  %v4900_v5 = vld [vmem:[%s5895_s1 + $0x20] sm:$0xff] }
  0x8e   :  { %4881 = vmatprep.subr.msk.mxu0 %vm76_vm1, %v565_v37 }
  0x90   :  { %v822_v39 = vpop.permute.xlu1 %821  ;;  %v820_v40 = vpop.permute.xlu0 %819  ;;  %4879 = vmatmul.mubr.msk.f32.vlgmr.msra.gmra.mrb[4].mxu0 %vm72_vm2, %v34_v32 }
  0x91   :  { %4882 = vmatpush1.msk.msra.mxu0 %vm76_vm1, %v564_v38  ;;  %649 = vmatprep.mubr.f32.mxu0 %v5100_v2  ;;  %v833_v50 = vsel %vm831_vm4, %v820_v40, %v822_v39 }
  0x92   :  { %4884 = vmatprep.subr.msk.mxu0 %vm76_vm1, %v567_v41 }
  0x94   :  { %v824_v44 = vpop.permute.xlu1 %823  ;;  %v818_v45 = vpop.permute.xlu0 %817  ;;  %4883 = vmatmul.mubr.msk.f32.vlgmr.msra.gmra.mrb[0].mxu0 %vm72_vm2, %v4880_v42 }
  0x95   :  { %4885 = vmatpush1.msk.msra.mxu0 %vm76_vm1, %v566_v43  ;;  %720 = vmatprep.mubr.f32.mxu0 %v5100_v2  ;;  %v832_v51 = vsel %vm831_vm4, %v818_v45, %v820_v40  ;;  %v834_v56 = vsel %vm831_vm4, %v822_v39, %v824_v44  ;;  %v4930_v43 = vld [vmem:[%s5895_s1 + $0x38] sm:$0xff] }
  0x96   :  { %4887 = vmatprep.subr.msk.mxu0 %vm76_vm1, %v569_v46 }
  0x98   :  { %v828_v48 = vpop.permute.xlu1 %827  ;;  %v826_v49 = vpop.permute.xlu0 %825  ;;  %4886 = vmatmul.mubr.msk.f32.vlgmr.msra.gmra.mrb[2].mxu0 %vm72_vm2, %v4880_v42 }
  0x99   :  { %4888 = vmatpush1.msk.msra.mxu0 %vm76_vm1, %v568_v47  ;;  %791 = vmatprep.mubr.f32.mxu0 %v5100_v2  ;;  %v835_v54 = vsel %vm831_vm4, %v824_v44, %v826_v49  ;;  %v836_v60 = vsel %vm831_vm4, %v826_v49, %v828_v48 }
  0x9a   :  { %4891 = vmatprep.subr.msk.mxu0 %vm76_vm1, %v833_v50 }
  0x9c   :  { %v1088_v52 = vpop.permute.xlu1 %1087  ;;  %v830_v53 = vpop.permute.xlu0 %829  ;;  %4889 = vmatmul.mubr.msk.f32.vlgmr.msra.gmra.mrb[4].mxu0 %vm72_vm2, %v4880_v42 }
  0x9d   :  { %4892 = vmatpush1.msk.msra.mxu0 %vm76_vm1, %v832_v51  ;;  %917 = vmatprep.mubr.f32.mxu0 %v5100_v2  ;;  %v837_v59 = vsel %vm831_vm4, %v828_v48, %v830_v53 }
  0x9e   :  { %4894 = vmatprep.subr.msk.mxu0 %vm76_vm1, %v835_v54 }
  0xa0   :  { %v1086_v57 = vpop.permute.xlu1 %1085  ;;  %v1090_v58 = vpop.permute.xlu0 %1089  ;;  %4893 = vmatmul.mubr.msk.f32.vlgmr.msra.gmra.mrb[0].mxu0 %vm72_vm2, %v4890_v55 }
  0xa1   :  { %4895 = vmatpush1.msk.msra.mxu0 %vm76_vm1, %v834_v56  ;;  %988 = vmatprep.mubr.f32.mxu0 %v5100_v2  ;;  %v1101_v63 = vsel %vm1099_vm5, %v1088_v52, %v1090_v58  ;;  %v1100_v0 = vsel %vm1099_vm5, %v1086_v57, %v1088_v52  ;;  %v4940_v56 = vld [vmem:[%s5895_s1 + $0x40] sm:$0xff] }
  0xa2   :  { %4897 = vmatprep.subr.msk.mxu0 %vm76_vm1, %v837_v59 }
  0xa4   :  { %v1094_v61 = vpop.permute.xlu1 %1093  ;;  %v1092_v62 = vpop.permute.xlu0 %1091  ;;  %4896 = vmatmul.mubr.msk.f32.vlgmr.msra.gmra.mrb[2].mxu0 %vm72_vm2, %v4890_v55 }
  0xa5   :  { %4898 = vmatpush1.msk.msra.mxu0 %vm76_vm1, %v836_v60  ;;  %1059 = vmatprep.mubr.f32.mxu0 %v5100_v2  ;;  %v1103_v4 = vsel %vm1099_vm5, %v1092_v62, %v1094_v61  ;;  %v1102_v6 = vsel %vm1099_vm5, %v1090_v58, %v1092_v62 }
  0xa6   :  { %4901 = vmatprep.subr.msk.mxu0 %vm76_vm1, %v1101_v63 }
  0xa8   :  { %v1098_v1 = vpop.permute.xlu1 %1097  ;;  %v1096_v3 = vpop.permute.xlu0 %1095  ;;  %4899 = vmatmul.mubr.msk.f32.vlgmr.msra.gmra.mrb[4].mxu0 %vm72_vm2, %v4890_v55 }
  0xa9   :  { %4902 = vmatpush1.msk.msra.mxu0 %vm76_vm1, %v1100_v0  ;;  %1185 = vmatprep.mubr.f32.mxu0 %v5100_v2  ;;  %v1105_v9 = vsel %vm1099_vm5, %v1096_v3, %v1098_v1  ;;  %v1104_v10 = vsel %vm1099_vm5, %v1094_v61, %v1096_v3  ;;  %v2413_v1 = vlaneseq }
  0xaa   :  { %4904 = vmatprep.subr.msk.mxu0 %vm76_vm1, %v1103_v4 }
  0xab   :  { %v5505_v3 = vshrl.u32 %v2413_v1, 7 }
  0xac   :  { %v1358_v7 = vpop.permute.xlu1 %1357  ;;  %v1356_v8 = vpop.permute.xlu0 %1355  ;;  %4903 = vmatmul.mubr.msk.f32.vlgmr.msra.gmra.mrb[0].mxu0 %vm72_vm2, %v4900_v5 }
  0xad   :  { %4905 = vmatpush1.msk.msra.mxu0 %vm76_vm1, %v1102_v6  ;;  %1256 = vmatprep.mubr.f32.mxu0 %v5100_v2  ;;  %v1369_v13 = vsel %vm1367_vm6, %v1356_v8, %v1358_v7  ;;  %v2415_v4 = vsub.s32 0, %v5505_v3  ;;  %v2419_v6 = vsub.s32 1, %v5505_v3 }
  0xae   :  { %4907 = vmatprep.subr.msk.mxu0 %vm76_vm1, %v1105_v9 }
  0xb0   :  { %v1360_v11 = vpop.permute.xlu1 %1359  ;;  %v1354_v12 = vpop.permute.xlu0 %1353  ;;  %4906 = vmatmul.mubr.msk.f32.vlgmr.msra.gmra.mrb[2].mxu0 %vm72_vm2, %v4900_v5 }
  0xb1   :  { %4908 = vmatpush1.msk.msra.mxu0 %vm76_vm1, %v1104_v10  ;;  %1327 = vmatprep.mubr.f32.mxu0 %v5100_v2  ;;  %v1368_v14 = vsel %vm1367_vm6, %v1354_v12, %v1356_v8  ;;  %v1370_v19 = vsel %vm1367_vm6, %v1358_v7, %v1360_v11  ;;  %v2423_v8 = vsub.s32 2, %v5505_v3  ;;  %v2427_v10 = vsub.s32 3, %v5505_v3 }
  0xb2   :  { %4911 = vmatprep.subr.msk.mxu0 %vm76_vm1, %v1369_v13 }
  0xb4   :  { %v1364_v15 = vpop.permute.xlu1 %1363  ;;  %v1362_v16 = vpop.permute.xlu0 %1361  ;;  %4909 = vmatmul.mubr.msk.f32.vlgmr.msra.gmra.mrb[4].mxu0 %vm72_vm2, %v4900_v5  ;;  %v32_v5 = vld [vmem:[%s5896_s7] sm:$0x3f] }
  0xb5   :  { %v1371_v17 = vsel %vm1367_vm6, %v1360_v11, %v1362_v16  ;;  %4912 = vmatpush1.msk.msra.mxu0 %vm76_vm1, %v1368_v14  ;;  %1453 = vmatprep.mubr.f32.mxu0 %v5100_v2  ;;  %v1372_v23 = vsel %vm1367_vm6, %v1362_v16, %v1364_v15  ;;  %v5514_v7 = vrot.slane %v32_v5, %v2415_v4 }
  0xb6   :  { %4914 = vmatprep.subr.msk.mxu0 %vm76_vm1, %v1371_v17  ;;  %v5519_v9 = vrot.slane %v32_v5, %v2419_v6  ;;  %v5528_v14 = vrot.slane %v32_v5, %v2423_v8  ;;  %v5534_v17 = vrot.slane %v32_v5, %v2427_v10 }
  0xb8   :  { %v1624_v20 = vpop.permute.xlu1 %1623  ;;  %v1366_v21 = vpop.permute.xlu0 %1365  ;;  %4913 = vmatmul.mubr.msk.f32.vlgmr.msra.gmra.mrb[0].mxu0 %vm72_vm2, %v4910_v18 }
  0xb9   :  { %v1373_v22 = vsel %vm1367_vm6, %v1364_v15, %v1366_v21  ;;  %4915 = vmatpush1.msk.msra.mxu0 %vm76_vm1, %v1370_v19  ;;  %1524 = vmatprep.mubr.f32.mxu0 %v5100_v2  ;;  %v2431_v15 = vsub.s32 4, %v5505_v3 }
  0xba   :  { %4917 = vmatprep.subr.msk.mxu0 %vm76_vm1, %v1373_v22 }
  0xbc   :  { %v1622_v24 = vpop.permute.xlu1 %1621  ;;  %v1626_v25 = vpop.permute.xlu0 %1625  ;;  %4916 = vmatmul.mubr.msk.f32.vlgmr.msra.gmra.mrb[2].mxu0 %vm72_vm2, %v4910_v18 }
  0xbd   :  { %v1637_v26 = vsel %vm1635_vm7, %v1624_v20, %v1626_v25  ;;  %4918 = vmatpush1.msk.msra.mxu0 %vm76_vm1, %v1372_v23  ;;  %1595 = vmatprep.mubr.f32.mxu0 %v5100_v2  ;;  %v1636_v27 = vsel %vm1635_vm7, %v1622_v24, %v1624_v20 }
  0xbe   :  { %4921 = vmatprep.subr.msk.mxu0 %vm76_vm1, %v1637_v26 }
  0xc0   :  { %v1630_v28 = vpop.permute.xlu1 %1629  ;;  %v1628_v29 = vpop.permute.xlu0 %1627  ;;  %4919 = vmatmul.mubr.msk.f32.vlgmr.msra.gmra.mrb[4].mxu0 %vm72_vm2, %v4910_v18  ;;  %v2435_v18 = vsub.s32 5, %v5505_v3 }
  0xc1   :  { %v1639_v30 = vsel %vm1635_vm7, %v1628_v29, %v1630_v28  ;;  %4922 = vmatpush1.msk.msra.mxu0 %vm76_vm1, %v1636_v27  ;;  %1721 = vmatprep.mubr.f32.mxu0 %v5100_v2  ;;  %v1638_v32 = vsel %vm1635_vm7, %v1626_v25, %v1628_v29  ;;  %v5540_v25 = vrot.slane %v32_v5, %v2431_v15 }
  0xc2   :  { %4924 = vmatprep.subr.msk.mxu0 %vm76_vm1, %v1639_v30 }
  0xc4   :  { %v1634_v33 = vpop.permute.xlu1 %1633  ;;  %v1632_v34 = vpop.permute.xlu0 %1631  ;;  %4923 = vmatmul.mubr.msk.f32.vlgmr.msra.gmra.mrb[0].mxu0 %vm72_vm2, %v4920_v31 }
  0xc5   :  { %v1641_v35 = vsel %vm1635_vm7, %v1632_v34, %v1634_v33  ;;  %4925 = vmatpush1.msk.msra.mxu0 %vm76_vm1, %v1638_v32  ;;  %1792 = vmatprep.mubr.f32.mxu0 %v5100_v2  ;;  %v1640_v36 = vsel %vm1635_vm7, %v1630_v28, %v1632_v34  ;;  %v5545_v28 = vrot.slane %v32_v5, %v2435_v18 }
  0xc6   :  { %4927 = vmatprep.subr.msk.mxu0 %vm76_vm1, %v1641_v35 }
  0xc8   :  { %v1894_v37 = vpop.permute.xlu1 %1893  ;;  %v1892_v38 = vpop.permute.xlu0 %1891  ;;  %4926 = vmatmul.mubr.msk.f32.vlgmr.msra.gmra.mrb[2].mxu0 %vm72_vm2, %v4920_v31 }
  0xc9   :  { %v1905_v39 = vsel %vm1903_vm8, %v1892_v38, %v1894_v37  ;;  %4928 = vmatpush1.msk.msra.mxu0 %vm76_vm1, %v1640_v36  ;;  %1863 = vmatprep.mubr.f32.mxu0 %v5100_v2 }
  0xca   :  { %4931 = vmatprep.subr.msk.mxu0 %vm76_vm1, %v1905_v39 }
  0xcc   :  { %v1896_v40 = vpop.permute.xlu1 %1895  ;;  %v1890_v41 = vpop.permute.xlu0 %1889  ;;  %4929 = vmatmul.mubr.msk.f32.vlgmr.msra.gmra.mrb[4].mxu0 %vm72_vm2, %v4920_v31 }
  0xcd   :  { %v1904_v42 = vsel %vm1903_vm8, %v1890_v41, %v1892_v38  ;;  %1989 = vmatprep.mubr.f32.mxu0 %v5100_v2  ;;  %v1906_v47 = vsel %vm1903_vm8, %v1894_v37, %v1896_v40 }
  0xce   :  { %4932 = vmatpush1.msk.msra.mxu0 %vm76_vm1, %v1904_v42 }
  0xd0   :  { %v1900_v44 = vpop.permute.xlu1 %1899  ;;  %v1898_v45 = vpop.permute.xlu0 %1897  ;;  %4933 = vmatmul.mubr.msk.f32.vlgmr.msra.gmra.mrb[0].mxu0 %vm72_vm2, %v4930_v43 }
  0xd1   :  { %v1907_v46 = vsel %vm1903_vm8, %v1896_v40, %v1898_v45  ;;  %2060 = vmatprep.mubr.f32.mxu0 %v5100_v2  ;;  %v1908_v51 = vsel %vm1903_vm8, %v1898_v45, %v1900_v44  ;;  %v5109_v45 = vmov 0  }
  0xd2   :  { %4934 = vmatprep.subr.msk.mxu0 %vm76_vm1, %v1907_v46  ;;  %5091 = vset.pattern.permute.xlu0 %v5109_v45 }
  0xd3   :  { %4935 = vmatpush1.msk.msra.mxu0 %vm76_vm1, %v1906_v47  ;;  %5092 = vset.pattern.permute.xlu1 %v5109_v45 }
  0xd4   :  { %v2160_v48 = vpop.permute.xlu1 %2159  ;;  %v1902_v49 = vpop.permute.xlu0 %1901  ;;  %4936 = vmatmul.mubr.msk.f32.vlgmr.msra.gmra.mrb[2].mxu0 %vm72_vm2, %v4930_v43 }
  0xd5   :  { %v1909_v50 = vsel %vm1903_vm8, %v1900_v44, %v1902_v49  ;;  %2131 = vmatprep.mubr.f32.mxu0 %v5100_v2 }
  0xd6   :  { %4937 = vmatprep.subr.msk.mxu0 %vm76_vm1, %v1909_v50 }
  0xd7   :  { %4938 = vmatpush1.msk.msra.mxu0 %vm76_vm1, %v1908_v51 }
  0xd8   :  { %v2158_v52 = vpop.permute.xlu1 %2157  ;;  %v2162_v53 = vpop.permute.xlu0 %2161  ;;  %4939 = vmatmul.mubr.msk.f32.vlgmr.msra.gmra.mrb[4].mxu0 %vm72_vm2, %v4930_v43 }
  0xd9   :  { %v2172_v54 = vsel %vm2171_vm9, %v2158_v52, %v2160_v48  ;;  %v2173_v55 = vsel %vm2171_vm9, %v2160_v48, %v2162_v53  ;;  %2257 = vmatprep.mubr.f32.mxu0 %v5100_v2 }
  0xda   :  { %4941 = vmatprep.subr.msk.mxu0 %vm76_vm1, %v2173_v55 }
  0xdb   :  { %4942 = vmatpush1.msk.msra.mxu0 %vm76_vm1, %v2172_v54  ;;  %v2474_v54 = vld [vmem:[%s5897_s2] sm:$0xff] }
  0xdc   :  { %v2166_v57 = vpop.permute.xlu1 %2165  ;;  %v2164_v58 = vpop.permute.xlu0 %2163  ;;  %4943 = vmatmul.mubr.msk.f32.vlgmr.msra.gmra.mrb[0].mxu0 %vm72_vm2, %v4940_v56 }
  0xdd   :  { %v2174_v59 = vsel %vm2171_vm9, %v2162_v53, %v2164_v58  ;;  %v2175_v60 = vsel %vm2171_vm9, %v2164_v58, %v2166_v57  ;;  %2328 = vmatprep.mubr.f32.mxu0 %v5100_v2 }
  0xde   :  { %4944 = vmatprep.subr.msk.mxu0 %vm76_vm1, %v2175_v60 }
  0xdf   :  { %4945 = vmatpush1.msk.msra.mxu0 %vm76_vm1, %v2174_v59 }
  0xe0   :  { %v2170_v61 = vpop.permute.xlu1 %2169  ;;  %v2168_v62 = vpop.permute.xlu0 %2167  ;;  %4946 = vmatmul.mubr.msk.f32.vlgmr.msra.gmra.mrb[2].mxu0 %vm72_vm2, %v4940_v56 }
  0xe1   :  { %v2176_v63 = vsel %vm2171_vm9, %v2166_v57, %v2168_v62  ;;  %v2177_v0 = vsel %vm2171_vm9, %v2168_v62, %v2170_v61  ;;  %2399 = vmatprep.mubr.f32.mxu0 %v5100_v2  ;;  %v2478_v57 = vld [vmem:[%s5898_s3] sm:$0xff] }
  0xe2   :  { %4947 = vmatprep.subr.msk.mxu0 %vm76_vm1, %v2177_v0 }
  0xe3   :  { %4948 = vmatpush1.msk.msra.mxu0 %vm76_vm1, %v2176_v63 }
  0xe4   :  { %4949 = vmatmul.mubr.msk.f32.vlgmr.msra.gmra.mrb[4].mxu0 %vm72_vm2, %v4940_v56 }
 0x1af   :  { %v5522_v11 = vpop.f32.mrb[0].mxu0 }
 0x1b0   :  { %v2443_v12 = vmul.f32 %v5514_v7, %v5522_v11  ;;  %v2261_v13 = vpop.f32.mrb[1].mxu0 }
 0x1b1   :  { %v2444_v16 = vmul.f32 %v5519_v9, %v2261_v13 }
 0x1b2   :  { %v2457_v19 = vmul.f32 %v2443_v12, %v2443_v12 }
 0x1b3   :  { %v2449_v20 = vadd.f32 %v2444_v16, %v2443_v12  ;;  %v2458_v21 = vmul.f32 %v2444_v16, %v2444_v16  ;;  %v2330_v22 = vpop.f32.mrb[2].mxu0 }
 0x1b4   :  { %v2445_v23 = vmul.f32 %v5528_v14, %v2330_v22  ;;  %v2332_v24 = vpop.f32.mrb[3].mxu0 }
 0x1b5   :  { %v2463_v26 = vadd.f32 %v2458_v21, %v2457_v19  ;;  %v2446_v27 = vmul.f32 %v5534_v17, %v2332_v24 }
 0x1b6   :  { %v2450_v29 = vadd.f32 %v2449_v20, %v2445_v23  ;;  %v2459_v30 = vmul.f32 %v2445_v23, %v2445_v23 }
 0x1b7   :  { %v2460_v31 = vmul.f32 %v2446_v27, %v2446_v27  ;;  %v5547_v32 = vpop.f32.mrb[4].mxu0 }
 0x1b8   :  { %v2464_v33 = vadd.f32 %v2463_v26, %v2459_v30  ;;  %v2451_v34 = vadd.f32 %v2450_v29, %v2446_v27  ;;  %v2447_v35 = vmul.f32 %v5540_v25, %v5547_v32  ;;  %v2403_v36 = vpop.f32.mrb[5].mxu0 }
 0x1b9   :  { %v2448_v37 = vmul.f32 %v5545_v28, %v2403_v36 }
 0x1ba   :  { %v2461_v38 = vmul.f32 %v2447_v35, %v2447_v35  ;;  %v2452_v39 = vadd.f32 %v2451_v34, %v2447_v35  ;;  %v2465_v40 = vadd.f32 %v2464_v33, %v2460_v31 }
 0x1bb   :  { %v2462_v41 = vmul.f32 %v2448_v37, %v2448_v37 }
 0x1bc   :  { %v2453_v42 = vadd.f32 %v2452_v39, %v2448_v37  ;;  %v2466_v43 = vadd.f32 %v2465_v40, %v2461_v38 }
 0x1be   :  { %2454 = vadd.xlane.f32.xlu0 %v2453_v42  ;;  %v2467_v44 = vadd.f32 %v2466_v43, %v2462_v41  ;;  %v4950_v41 = vld [vmem:[%s5899_s4 + $0x8] sm:$0xff] }
 0x1c0   :  { %2468 = vadd.xlane.f32.xlu1 %v2467_v44 }
 0x24b   :  { %v2455_v46 = vpop.xlane.xlu0 %2454 }
 0x24c   :  { %v2456_v47 = vmul.f32 0.001953125, %v2455_v46 }
 0x24d   :  { %v2469_v48 = vpop.xlane.xlu1 %2468 }
 0x24e   :  { %v2471_v49 = vmul.f32 %v2456_v47, %v2456_v47  ;;  %v2470_v50 = vmul.f32 0.001953125, %v2469_v48 }
 0x250   :  { %v2472_v51 = vsub.f32 %v2470_v50, %v2471_v49 }
 0x252   :  { %v2473_v52 = vmax.f32 %v2472_v51, 0.0 }
 0x254   :  { %v2475_v53 = vadd.f32 1e-05, %v2473_v52 }
 0x256   :  { %5096 = vrsqrt.f32 %v2475_v53 }
 0x260   :  { %v5097_v55 = vpop.eup %5096 }
 0x261   :  { %v2477_v56 = vmul.f32 %v5097_v55, %v2474_v54  ;;  %v2522_v54 = vld [vmem:[%s5899_s4] sm:$0xff] }
 0x263   :  { %2483 = vperm.xlu0 %5091, %v2477_v56   ;;  %v2479_v58 = vmul.f32 %v2477_v56, %v2456_v47 }
 0x265   :  { %v2480_v59 = vsub.f32 %v2478_v57, %v2479_v58 }
 0x267   :  { %2494 = vperm.xlu1 %5092, %v2480_v59   ;;  %2557 = vrot.lane.b32.xlu0 %v5100_v2, %s5101_s13 }
 0x26b   :  { %3268 = vrot.lane.b32.xlu0 %v5100_v2, %s5103_s21  ;;  %3018 = vrot.lane.b32.xlu1 %v5100_v2, %s5102_s18 }
 0x26f   :  { %3768 = vrot.lane.b32.xlu0 %v5100_v2, %s5105_s27 }
 0x2e2   :  { %v2484_v60 = vpop.permute.xlu0 %2483 }
 0x2e3   :  { %v2487_v61 = vmul.f32 %v2484_v60, %v2261_v13  ;;  %v2488_v62 = vmul.f32 %v2484_v60, %v2330_v22  ;;  %v2489_v63 = vmul.f32 %v2484_v60, %v2332_v24  ;;  %v2486_v16 = vmul.f32 %v2484_v60, %v5522_v11 }
 0x2e4   :  { %v2491_v19 = vmul.f32 %v2484_v60, %v2403_v36  ;;  %v2490_v24 = vmul.f32 %v2484_v60, %v5547_v32 }
 0x2e6   :  { %v2495_v0 = vpop.permute.xlu1 %2494 }
 0x2e7   :  { %v2498_v1 = vadd.f32 %v2495_v0, %v2487_v61  ;;  %v2499_v5 = vadd.f32 %v2495_v0, %v2488_v62  ;;  %v2500_v12 = vadd.f32 %v2495_v0, %v2489_v63  ;;  %v2497_v23 = vadd.f32 %v2495_v0, %v2486_v16  ;;  %v4957_v62 = vld [vmem:[%s5899_s4 + $0x10] sm:$0xff] }
 0x2e8   :  { %v2502_v26 = vadd.f32 %v2495_v0, %v2491_v19 }
 0x2e9   :  { %v2504_v20 = vmax.f32 %v2498_v1, 0.0  ;;  %v2505_v21 = vmax.f32 %v2499_v5, 0.0  ;;  %v2506_v27 = vmax.f32 %v2500_v12, 0.0  ;;  %v2503_v13 = vmax.f32 %v2497_v23, 0.0 }
 0x2ea   :  { %v2508_v11 = vmax.f32 %v2502_v26, 0.0  ;;  %v5690_v33 = vpop.permute.xlu1 %3018 }
 0x2eb   :  { %v5568_v29 = vmul.f32 %v2504_v20, %v5519_v9  ;;  %v5571_v30 = vmul.f32 %v2505_v21, %v5528_v14  ;;  %v5578_v22 = vmul.f32 %v2506_v27, %v5534_v17  ;;  %v2501_v9 = vadd.f32 %v2495_v0, %v2490_v24 }
 0x2ec   :  { %v5586_v14 = vmul.f32 %v2503_v13, %v5514_v7  ;;  %v5589_v31 = vmul.f32 %v2508_v11, %v5545_v28  ;;  %v2558_v7 = vpop.permute.xlu0 %2557 }
 0x2ed   :  { %3010 = vrot.lane.b32.xlu0 %v5571_v30, %s5102_s18  ;;  %2547 = vrot.lane.b32.xlu1 %v5568_v29, %s5101_s13  ;;  %v2507_v17 = vmax.f32 %v2501_v9, 0.0 }
 0x2ef   :  { %v5600_v32 = vmul.f32 %v2507_v17, %v5540_v25 }
 0x2f0   :  { %v5682_v25 = vpop.permute.xlu0 %3268 }
 0x2f1   :  { %3012 = vrot.lane.b32.xlu0 %v5578_v22, %s5102_s18  ;;  %2549 = vrot.lane.b32.xlu1 %v5571_v30, %s5101_s13 }
 0x2f4   :  { %v5688_v28 = vpop.permute.xlu0 %3768 }
 0x2f5   :  { %3016 = vrot.lane.b32.xlu0 %v5589_v31, %s5102_s18  ;;  %2545 = vrot.lane.b32.xlu1 %v5586_v14, %s5101_s13 }
 0x2f9   :  { %3258 = vrot.lane.b32.xlu0 %v5568_v29, %s5103_s21  ;;  %2551 = vrot.lane.b32.xlu1 %v5578_v22, %s5101_s13 }
 0x2fd   :  { %3256 = vrot.lane.b32.xlu0 %v5586_v14, %s5103_s21  ;;  %2553 = vrot.lane.b32.xlu1 %v5600_v32, %s5101_s13 }
 0x301   :  { %3264 = vrot.lane.b32.xlu0 %v5600_v32, %s5103_s21  ;;  %2555 = vrot.lane.b32.xlu1 %v5589_v31, %s5101_s13 }
 0x305   :  { %3510 = vrot.lane.b32.xlu0 %v5571_v30, %s5104_s24  ;;  %3518 = vrot.lane.b32.xlu1 %v5100_v2, %s5104_s24 }
 0x309   :  { %3512 = vrot.lane.b32.xlu0 %v5578_v22, %s5104_s24  ;;  %4018 = vrot.lane.b32.xlu1 %v5100_v2, %s5106_s30 }
 0x30d   :  { %3516 = vrot.lane.b32.xlu0 %v5589_v31, %s5104_s24  ;;  %3008 = vrot.lane.b32.xlu1 %v5568_v29, %s5102_s18 }
 0x311   :  { %3758 = vrot.lane.b32.xlu0 %v5568_v29, %s5105_s27  ;;  %3006 = vrot.lane.b32.xlu1 %v5586_v14, %s5102_s18 }
 0x315   :  { %3756 = vrot.lane.b32.xlu0 %v5586_v14, %s5105_s27  ;;  %3014 = vrot.lane.b32.xlu1 %v5600_v32, %s5102_s18 }
 0x319   :  { %3764 = vrot.lane.b32.xlu0 %v5600_v32, %s5105_s27  ;;  %3260 = vrot.lane.b32.xlu1 %v5571_v30, %s5103_s21 }
 0x31d   :  { %4010 = vrot.lane.b32.xlu0 %v5571_v30, %s5106_s30  ;;  %3262 = vrot.lane.b32.xlu1 %v5578_v22, %s5103_s21 }
 0x321   :  { %4012 = vrot.lane.b32.xlu0 %v5578_v22, %s5106_s30  ;;  %3266 = vrot.lane.b32.xlu1 %v5589_v31, %s5103_s21 }
 0x325   :  { %4016 = vrot.lane.b32.xlu0 %v5589_v31, %s5106_s30  ;;  %3508 = vrot.lane.b32.xlu1 %v5568_v29, %s5104_s24 }
 0x329   :  { %4258 = vrot.lane.b32.xlu0 %v5568_v29, %s5107_s12  ;;  %3506 = vrot.lane.b32.xlu1 %v5586_v14, %s5104_s24 }
 0x32d   :  { %4256 = vrot.lane.b32.xlu0 %v5586_v14, %s5107_s12  ;;  %3514 = vrot.lane.b32.xlu1 %v5600_v32, %s5104_s24 }
 0x331   :  { %4264 = vrot.lane.b32.xlu0 %v5600_v32, %s5107_s12  ;;  %3760 = vrot.lane.b32.xlu1 %v5571_v30, %s5105_s27 }
 0x335   :  { %4268 = vrot.lane.b32.xlu0 %v5100_v2, %s5107_s12  ;;  %3762 = vrot.lane.b32.xlu1 %v5578_v22, %s5105_s27 }
 0x339   :  { %4510 = vrot.lane.b32.xlu0 %v5571_v30, %s5108_s16  ;;  %3766 = vrot.lane.b32.xlu1 %v5589_v31, %s5105_s27 }
 0x33d   :  { %4512 = vrot.lane.b32.xlu0 %v5578_v22, %s5108_s16  ;;  %4008 = vrot.lane.b32.xlu1 %v5568_v29, %s5106_s30 }
 0x341   :  { %4516 = vrot.lane.b32.xlu0 %v5589_v31, %s5108_s16  ;;  %4006 = vrot.lane.b32.xlu1 %v5586_v14, %s5106_s30 }
 0x345   :  { %4014 = vrot.lane.b32.xlu1 %v5600_v32, %s5106_s30 }
 0x349   :  { %4260 = vrot.lane.b32.xlu1 %v5571_v30, %s5107_s12 }
 0x34d   :  { %4262 = vrot.lane.b32.xlu1 %v5578_v22, %s5107_s12 }
 0x351   :  { %4266 = vrot.lane.b32.xlu1 %v5589_v31, %s5107_s12 }
 0x355   :  { %4508 = vrot.lane.b32.xlu1 %v5568_v29, %s5108_s16 }
 0x359   :  { %4506 = vrot.lane.b32.xlu1 %v5586_v14, %s5108_s16 }
 0x35d   :  { %4514 = vrot.lane.b32.xlu1 %v5600_v32, %s5108_s16 }
 0x35f   :  { %v5694_v34 = vpop.permute.xlu0 %3010  ;;  %v2548_v35 = vpop.permute.xlu1 %2547 }
 0x361   :  { %4518 = vrot.lane.b32.xlu1 %v5100_v2, %s5108_s16 }
 0x363   :  { %v3013_v36 = vpop.permute.xlu0 %3012  ;;  %v2550_v37 = vpop.permute.xlu1 %2549 }
 0x364   :  { %v2560_v38 = vsel %vm65_vm0, %v2548_v35, %v2550_v37  ;;  %v3022_v5 = vsel %vm563_vm3, %v5694_v34, %v3013_v36 }
 0x365   :  { %2575 = vmatprep.subr.mxu1 %v2560_v38 }
 0x367   :  { %v3017_v39 = vpop.permute.xlu0 %3016  ;;  %v2546_v40 = vpop.permute.xlu1 %2545 }
 0x368   :  { %v2559_v42 = vsel %vm65_vm0, %v2546_v40, %v2548_v35  ;;  %v3025_v12 = vsel %vm563_vm3, %v3017_v39, %v5690_v33 }
 0x369   :  { %2576 = vmatpush1.msra.mxu1 %v2559_v42 }
 0x36a   :  { %4951 = vmatmul.mubr.msk.f32.vlgmr.msra.gmra.mrb[0].mxu1 %vm2571_vm10, %v4950_v41 }
 0x36b   :  { %v3259_v43 = vpop.permute.xlu0 %3258  ;;  %v2552_v44 = vpop.permute.xlu1 %2551  ;;  %2710 = vmatprep.mubr.f32.mxu1 %v5100_v2 }
 0x36c   :  { %v2561_v48 = vsel %vm65_vm0, %v2550_v37, %v2552_v44 }
 0x36f   :  { %v3257_v45 = vpop.permute.xlu0 %3256  ;;  %v2554_v46 = vpop.permute.xlu1 %2553 }
 0x370   :  { %v2562_v47 = vsel %vm65_vm0, %v2552_v44, %v2554_v46  ;;  %v3270_v23 = vsel %vm831_vm4, %v3257_v45, %v3259_v43  ;;  %v4969_v44 = vld [vmem:[%s5899_s4 + $0x28] sm:$0xff] }
 0x371   :  { %2646 = vmatprep.subr.mxu1 %v2562_v47 }
 0x372   :  { %2647 = vmatpush1.msra.mxu1 %v2561_v48 }
 0x373   :  { %v5707_v49 = vpop.permute.xlu0 %3264  ;;  %4952 = vmatmul.mubr.msk.f32.vlgmr.msra.gmra.mrb[2].mxu1 %vm2571_vm10, %v4950_v41  ;;  %v2556_v50 = vpop.permute.xlu1 %2555 }
 0x374   :  { %v2563_v51 = vsel %vm65_vm0, %v2554_v46, %v2556_v50  ;;  %v2564_v52 = vsel %vm65_vm0, %v2556_v50, %v2558_v7  ;;  %2781 = vmatprep.mubr.f32.mxu1 %v5100_v2  ;;  %v4965_v7 = vld [vmem:[%s5899_s4 + $0x20] sm:$0xff] }
 0x375   :  { %2717 = vmatprep.subr.mxu1 %v2564_v52 }
 0x376   :  { %2718 = vmatpush1.msra.mxu1 %v2563_v51 }
 0x377   :  { %4953 = vmatmul.mubr.msk.f32.vlgmr.msra.gmra.mrb[4].mxu1 %vm2571_vm10, %v4950_v41  ;;  %2791 = vmatprep.subr.mxu1 %v5568_v29  ;;  %v5715_v53 = vpop.permute.xlu1 %3518  ;;  %v5722_v55 = vpop.permute.xlu0 %3510  ;;  %v4961_v29 = vld [vmem:[%s5899_s4 + $0x18] sm:$0xff] }
 0x378   :  { %2792 = vmatpush1.msra.mxu1 %v5586_v14  ;;  %2855 = vmatprep.mubr.f32.mxu1 %v5100_v2 }
 0x379   :  { %2862 = vmatprep.subr.mxu1 %v5578_v22 }
 0x37b   :  { %4954 = vmatmul.mubr.msk.f32.vlgmr.msra.gmra.mrb[0].mxu1 %vm2571_vm10, %v2522_v54  ;;  %v5726_v56 = vpop.permute.xlu1 %4018  ;;  %v5731_v57 = vpop.permute.xlu0 %3512 }
 0x37c   :  { %2863 = vmatpush1.msra.mxu1 %v5571_v30  ;;  %2926 = vmatprep.mubr.f32.mxu1 %v5100_v2  ;;  %v3522_v35 = vsel %vm1099_vm5, %v5722_v55, %v5731_v57 }
 0x37d   :  { %2933 = vmatprep.subr.mxu1 %v5589_v31 }
 0x37f   :  { %4955 = vmatmul.mubr.msk.f32.vlgmr.msra.gmra.mrb[2].mxu1 %vm2571_vm10, %v2522_v54  ;;  %v3009_v58 = vpop.permute.xlu1 %3008  ;;  %v3517_v63 = vpop.permute.xlu0 %3516 }
 0x380   :  { %2934 = vmatpush1.msra.mxu1 %v5600_v32  ;;  %v3021_v59 = vsel %vm563_vm3, %v3009_v58, %v5694_v34  ;;  %2997 = vmatprep.mubr.f32.mxu1 %v5100_v2 }
 0x381   :  { %3035 = vmatprep.subr.mxu1 %v3021_v59 }
 0x383   :  { %4956 = vmatmul.mubr.msk.f32.vlgmr.msra.gmra.mrb[4].mxu1 %vm2571_vm10, %v2522_v54  ;;  %v3007_v60 = vpop.permute.xlu1 %3006  ;;  %v3759_v16 = vpop.permute.xlu0 %3758  ;;  %v4973_v54 = vld [vmem:[%s5899_s4 + $0x30] sm:$0xff] }
 0x384   :  { %v3020_v61 = vsel %vm563_vm3, %v3007_v60, %v3009_v58  ;;  %3099 = vmatprep.mubr.f32.mxu1 %v5100_v2 }
 0x385   :  { %3036 = vmatpush1.msra.mxu1 %v3020_v61 }
 0x387   :  { %4958 = vmatmul.mubr.msk.f32.vlgmr.msra.gmra.mrb[0].mxu1 %vm2571_vm10, %v4957_v62  ;;  %v3015_v0 = vpop.permute.xlu1 %3014  ;;  %v3757_v30 = vpop.permute.xlu0 %3756 }
 0x388   :  { %v3023_v1 = vsel %vm563_vm3, %v3013_v36, %v3015_v0  ;;  %3170 = vmatprep.mubr.f32.mxu1 %v5100_v2  ;;  %v3024_v19 = vsel %vm563_vm3, %v3015_v0, %v3017_v39  ;;  %v3525_v36 = vsel %vm1099_vm5, %v3517_v63, %v5715_v53  ;;  %v3770_v41 = vsel %vm1367_vm6, %v3757_v30, %v3759_v16 }
 0x389   :  { %3106 = vmatprep.subr.mxu1 %v3023_v1 }
 0x38a   :  { %3107 = vmatpush1.msra.mxu1 %v3022_v5 }
 0x38b   :  { %4959 = vmatmul.mubr.msk.f32.vlgmr.msra.gmra.mrb[2].mxu1 %vm2571_vm10, %v4957_v62  ;;  %3177 = vmatprep.subr.mxu1 %v3025_v12  ;;  %v3261_v20 = vpop.permute.xlu1 %3260  ;;  %v3765_v24 = vpop.permute.xlu0 %3764  ;;  %v4977_v12 = vld [vmem:[%s5899_s4 + $0x38] sm:$0xff] }
 0x38c   :  { %3178 = vmatpush1.msra.mxu1 %v3024_v19  ;;  %v3271_v21 = vsel %vm831_vm4, %v3259_v43, %v3261_v20  ;;  %3241 = vmatprep.mubr.f32.mxu1 %v5100_v2 }
 0x38d   :  { %3285 = vmatprep.subr.mxu1 %v3271_v21 }
 0x38f   :  { %4960 = vmatmul.mubr.msk.f32.vlgmr.msra.gmra.mrb[4].mxu1 %vm2571_vm10, %v4957_v62  ;;  %v3263_v26 = vpop.permute.xlu1 %3262 }
 0x390   :  { %3286 = vmatpush1.msra.mxu1 %v3270_v23  ;;  %v3273_v27 = vsel %vm831_vm4, %v3263_v26, %v5707_v49  ;;  %3349 = vmatprep.mubr.f32.mxu1 %v5100_v2  ;;  %v3272_v13 = vsel %vm831_vm4, %v3261_v20, %v3263_v26 }
 0x391   :  { %3356 = vmatprep.subr.mxu1 %v3273_v27 }
 0x393   :  { %4962 = vmatmul.mubr.msk.f32.vlgmr.msra.gmra.mrb[0].mxu1 %vm2571_vm10, %v4961_v29  ;;  %v3267_v11 = vpop.permute.xlu1 %3266 }
 0x394   :  { %3357 = vmatpush1.msra.mxu1 %v3272_v13  ;;  %v3275_v22 = vsel %vm831_vm4, %v3267_v11, %v5682_v25  ;;  %3420 = vmatprep.mubr.f32.mxu1 %v5100_v2  ;;  %v3274_v9 = vsel %vm831_vm4, %v5707_v49, %v3267_v11  ;;  %v4011_v25 = vpop.permute.xlu0 %4010  ;;  %v4981_v11 = vld [vmem:[%s5899_s4 + $0x40] sm:$0xff] }
 0x395   :  { %3427 = vmatprep.subr.mxu1 %v3275_v22 }
 0x397   :  { %4963 = vmatmul.mubr.msk.f32.vlgmr.msra.gmra.mrb[2].mxu1 %vm2571_vm10, %v4961_v29  ;;  %v3509_v14 = vpop.permute.xlu1 %3508 }
 0x398   :  { %3428 = vmatpush1.msra.mxu1 %v3274_v9  ;;  %v3521_v31 = vsel %vm1099_vm5, %v3509_v14, %v5722_v55  ;;  %3491 = vmatprep.mubr.f32.mxu1 %v5100_v2  ;;  %v4013_v37 = vpop.permute.xlu0 %4012 }
 0x399   :  { %3535 = vmatprep.subr.mxu1 %v3521_v31  ;;  %v4022_v59 = vsel %vm1635_vm7, %v4011_v25, %v4013_v37 }
 0x39b   :  { %4964 = vmatmul.mubr.msk.f32.vlgmr.msra.gmra.mrb[4].mxu1 %vm2571_vm10, %v4961_v29  ;;  %v3507_v17 = vpop.permute.xlu1 %3506 }
 0x39c   :  { %v3520_v32 = vsel %vm1099_vm5, %v3507_v17, %v3509_v14  ;;  %3599 = vmatprep.mubr.f32.mxu1 %v5100_v2  ;;  %v4017_v45 = vpop.permute.xlu0 %4016 }
 0x39d   :  { %3536 = vmatpush1.msra.mxu1 %v3520_v32  ;;  %v4025_v60 = vsel %vm1635_vm7, %v4017_v45, %v5726_v56 }
 0x39f   :  { %4966 = vmatmul.mubr.msk.f32.vlgmr.msra.gmra.mrb[0].mxu1 %vm2571_vm10, %v4965_v7  ;;  %v3515_v33 = vpop.permute.xlu1 %3514 }
 0x3a0   :  { %v3523_v34 = vsel %vm1099_vm5, %v5731_v57, %v3515_v33  ;;  %3670 = vmatprep.mubr.f32.mxu1 %v5100_v2  ;;  %v3524_v38 = vsel %vm1099_vm5, %v3515_v33, %v3517_v63  ;;  %v4259_v49 = vpop.permute.xlu0 %4258 }
 0x3a1   :  { %3606 = vmatprep.subr.mxu1 %v3523_v34 }
 0x3a2   :  { %3607 = vmatpush1.msra.mxu1 %v3522_v35 }
 0x3a3   :  { %4967 = vmatmul.mubr.msk.f32.vlgmr.msra.gmra.mrb[2].mxu1 %vm2571_vm10, %v4965_v7  ;;  %3677 = vmatprep.subr.mxu1 %v3525_v36  ;;  %v3761_v39 = vpop.permute.xlu1 %3760 }
 0x3a4   :  { %3678 = vmatpush1.msra.mxu1 %v3524_v38  ;;  %v3771_v40 = vsel %vm1367_vm6, %v3759_v16, %v3761_v39  ;;  %3741 = vmatprep.mubr.f32.mxu1 %v5100_v2  ;;  %v4257_v55 = vpop.permute.xlu0 %4256 }
 0x3a5   :  { %3785 = vmatprep.subr.mxu1 %v3771_v40  ;;  %v4270_v1 = vsel %vm1903_vm8, %v4257_v55, %v4259_v49 }
 0x3a7   :  { %4968 = vmatmul.mubr.msk.f32.vlgmr.msra.gmra.mrb[4].mxu1 %vm2571_vm10, %v4965_v7  ;;  %v3763_v42 = vpop.permute.xlu1 %3762 }
 0x3a8   :  { %3786 = vmatpush1.msra.mxu1 %v3770_v41  ;;  %v3773_v43 = vsel %vm1367_vm6, %v3763_v42, %v3765_v24  ;;  %3849 = vmatprep.mubr.f32.mxu1 %v5100_v2  ;;  %v3772_v46 = vsel %vm1367_vm6, %v3761_v39, %v3763_v42  ;;  %v4265_v61 = vpop.permute.xlu0 %4264 }
 0x3a9   :  { %3856 = vmatprep.subr.mxu1 %v3773_v43 }
 0x3ab   :  { %4970 = vmatmul.mubr.msk.f32.vlgmr.msra.gmra.mrb[0].mxu1 %vm2571_vm10, %v4969_v44  ;;  %v3767_v47 = vpop.permute.xlu1 %3766 }
 0x3ac   :  { %3857 = vmatpush1.msra.mxu1 %v3772_v46  ;;  %v3775_v48 = vsel %vm1367_vm6, %v3767_v47, %v5688_v28  ;;  %3920 = vmatprep.mubr.f32.mxu1 %v5100_v2  ;;  %v3774_v50 = vsel %vm1367_vm6, %v3765_v24, %v3767_v47  ;;  %v4269_v16 = vpop.permute.xlu0 %4268 }
 0x3ad   :  { %3927 = vmatprep.subr.mxu1 %v3775_v48 }
 0x3af   :  { %4971 = vmatmul.mubr.msk.f32.vlgmr.msra.gmra.mrb[2].mxu1 %vm2571_vm10, %v4969_v44  ;;  %v4009_v51 = vpop.permute.xlu1 %4008 }
 0x3b0   :  { %3928 = vmatpush1.msra.mxu1 %v3774_v50  ;;  %v4021_v52 = vsel %vm1635_vm7, %v4009_v51, %v4011_v25  ;;  %3991 = vmatprep.mubr.f32.mxu1 %v5100_v2  ;;  %v4511_v23 = vpop.permute.xlu0 %4510  ;;  %v33_v25 = vld [vmem:[%s5900_s8] sm:$0x3f] }
 0x3b1   :  { %4035 = vmatprep.subr.mxu1 %v4021_v52  ;;  %v4758_v33 = vrot.slane %v33_v25, %v2415_v4  ;;  %v4762_v34 = vrot.slane %v33_v25, %v2419_v6  ;;  %v4770_v39 = vrot.slane %v33_v25, %v2427_v10  ;;  %v4774_v4 = vrot.slane %v33_v25, %v2431_v15 }
 0x3b2   :  { %v4778_v47 = vrot.slane %v33_v25, %v2435_v18 }
 0x3b3   :  { %4972 = vmatmul.mubr.msk.f32.vlgmr.msra.gmra.mrb[4].mxu1 %vm2571_vm10, %v4969_v44  ;;  %v4007_v53 = vpop.permute.xlu1 %4006 }
 0x3b4   :  { %v4020_v28 = vsel %vm1635_vm7, %v4007_v53, %v4009_v51  ;;  %4099 = vmatprep.mubr.f32.mxu1 %v5100_v2  ;;  %v4513_v22 = vpop.permute.xlu0 %4512 }
 0x3b5   :  { %4036 = vmatpush1.msra.mxu1 %v4020_v28  ;;  %v4522_v14 = vsel %vm2171_vm9, %v4511_v23, %v4513_v22 }
 0x3b7   :  { %4974 = vmatmul.mubr.msk.f32.vlgmr.msra.gmra.mrb[0].mxu1 %vm2571_vm10, %v4973_v54  ;;  %v4015_v57 = vpop.permute.xlu1 %4014 }
 0x3b8   :  { %v4023_v58 = vsel %vm1635_vm7, %v4013_v37, %v4015_v57  ;;  %4170 = vmatprep.mubr.f32.mxu1 %v5100_v2  ;;  %v4024_v62 = vsel %vm1635_vm7, %v4015_v57, %v4017_v45  ;;  %v4517_v31 = vpop.permute.xlu0 %4516 }
 0x3b9   :  { %4106 = vmatprep.subr.mxu1 %v4023_v58 }
 0x3ba   :  { %4107 = vmatpush1.msra.mxu1 %v4022_v59 }
 0x3bb   :  { %4975 = vmatmul.mubr.msk.f32.vlgmr.msra.gmra.mrb[2].mxu1 %vm2571_vm10, %v4973_v54  ;;  %4177 = vmatprep.subr.mxu1 %v4025_v60  ;;  %v4261_v63 = vpop.permute.xlu1 %4260 }
 0x3bc   :  { %4178 = vmatpush1.msra.mxu1 %v4024_v62  ;;  %v4271_v0 = vsel %vm1903_vm8, %v4259_v49, %v4261_v63  ;;  %4241 = vmatprep.mubr.f32.mxu1 %v5100_v2 }
 0x3bd   :  { %4285 = vmatprep.subr.mxu1 %v4271_v0 }
 0x3bf   :  { %4976 = vmatmul.mubr.msk.f32.vlgmr.msra.gmra.mrb[4].mxu1 %vm2571_vm10, %v4973_v54  ;;  %v4263_v5 = vpop.permute.xlu1 %4262 }
 0x3c0   :  { %4286 = vmatpush1.msra.mxu1 %v4270_v1  ;;  %v4273_v56 = vsel %vm1903_vm8, %v4263_v5, %v4265_v61  ;;  %4349 = vmatprep.mubr.f32.mxu1 %v5100_v2  ;;  %v4272_v19 = vsel %vm1903_vm8, %v4261_v63, %v4263_v5 }
 0x3c1   :  { %4356 = vmatprep.subr.mxu1 %v4273_v56  ;;  %v4816_v56 = vld [vmem:[%s5901_s5] sm:$0xff] }
 0x3c3   :  { %4978 = vmatmul.mubr.msk.f32.vlgmr.msra.gmra.mrb[0].mxu1 %vm2571_vm10, %v4977_v12  ;;  %v4267_v20 = vpop.permute.xlu1 %4266 }
 0x3c4   :  { %4357 = vmatpush1.msra.mxu1 %v4272_v19  ;;  %v4275_v21 = vsel %vm1903_vm8, %v4267_v20, %v4269_v16  ;;  %4420 = vmatprep.mubr.f32.mxu1 %v5100_v2  ;;  %v4274_v26 = vsel %vm1903_vm8, %v4265_v61, %v4267_v20  ;;  %v4820_v19 = vld [vmem:[%s5902_s6] sm:$0xff] }
 0x3c5   :  { %4427 = vmatprep.subr.mxu1 %v4275_v21 }
 0x3c7   :  { %4979 = vmatmul.mubr.msk.f32.vlgmr.msra.gmra.mrb[2].mxu1 %vm2571_vm10, %v4977_v12  ;;  %v4509_v27 = vpop.permute.xlu1 %4508 }
 0x3c8   :  { %4428 = vmatpush1.msra.mxu1 %v4274_v26  ;;  %v4521_v29 = vsel %vm2171_vm9, %v4509_v27, %v4511_v23  ;;  %4491 = vmatprep.mubr.f32.mxu1 %v5100_v2 }
 0x3c9   :  { %4535 = vmatprep.subr.mxu1 %v4521_v29 }
 0x3cb   :  { %4980 = vmatmul.mubr.msk.f32.vlgmr.msra.gmra.mrb[4].mxu1 %vm2571_vm10, %v4977_v12  ;;  %v4507_v30 = vpop.permute.xlu1 %4506 }
 0x3cc   :  { %v4520_v13 = vsel %vm2171_vm9, %v4507_v30, %v4509_v27  ;;  %4599 = vmatprep.mubr.f32.mxu1 %v5100_v2 }
 0x3cd   :  { %4536 = vmatpush1.msra.mxu1 %v4520_v13 }
 0x3cf   :  { %4982 = vmatmul.mubr.msk.f32.vlgmr.msra.gmra.mrb[0].mxu1 %vm2571_vm10, %v4981_v11  ;;  %v4515_v24 = vpop.permute.xlu1 %4514 }
 0x3d0   :  { %v4523_v9 = vsel %vm2171_vm9, %v4513_v22, %v4515_v24  ;;  %4670 = vmatprep.mubr.f32.mxu1 %v5100_v2  ;;  %v4524_v7 = vsel %vm2171_vm9, %v4515_v24, %v4517_v31 }
 0x3d1   :  { %4606 = vmatprep.subr.mxu1 %v4523_v9 }
 0x3d2   :  { %4607 = vmatpush1.msra.mxu1 %v4522_v14 }
 0x3d3   :  { %4983 = vmatmul.mubr.msk.f32.vlgmr.msra.gmra.mrb[2].mxu1 %vm2571_vm10, %v4981_v11  ;;  %v4519_v17 = vpop.permute.xlu1 %4518 }
 0x3d4   :  { %v4525_v32 = vsel %vm2171_vm9, %v4517_v31, %v4519_v17  ;;  %4741 = vmatprep.mubr.f32.mxu1 %v5100_v2  ;;  %v4766_v2 = vrot.slane %v33_v25, %v2423_v8 }
 0x3d5   :  { %4677 = vmatprep.subr.mxu1 %v4525_v32 }
 0x3d6   :  { %4678 = vmatpush1.msra.mxu1 %v4524_v7 }
 0x3d7   :  { %4984 = vmatmul.mubr.msk.f32.vlgmr.msra.gmra.mrb[4].mxu1 %vm2571_vm10, %v4981_v11 }
 0x4a2   :  { %v4601_v35 = vpop.f32.mrb[0].mxu1 }
 0x4a3   :  { %v4785_v36 = vmul.f32 %v4758_v33, %v4601_v35  ;;  %v4603_v37 = vpop.f32.mrb[1].mxu1 }
 0x4a4   :  { %v4786_v38 = vmul.f32 %v4762_v34, %v4603_v37 }
 0x4a5   :  { %v4799_v40 = vmul.f32 %v4785_v36, %v4785_v36 }
 0x4a6   :  { %v4791_v41 = vadd.f32 %v4786_v38, %v4785_v36  ;;  %v4800_v42 = vmul.f32 %v4786_v38, %v4786_v38  ;;  %v4672_v43 = vpop.f32.mrb[2].mxu1 }
 0x4a7   :  { %v4787_v44 = vmul.f32 %v4766_v2, %v4672_v43  ;;  %v4674_v45 = vpop.f32.mrb[3].mxu1 }
 0x4a8   :  { %v4805_v6 = vadd.f32 %v4800_v42, %v4799_v40  ;;  %v4788_v46 = vmul.f32 %v4770_v39, %v4674_v45 }
 0x4a9   :  { %v4792_v48 = vadd.f32 %v4791_v41, %v4787_v44  ;;  %v4801_v8 = vmul.f32 %v4787_v44, %v4787_v44 }
 0x4aa   :  { %v4802_v49 = vmul.f32 %v4788_v46, %v4788_v46  ;;  %v4743_v50 = vpop.f32.mrb[4].mxu1 }
 0x4ab   :  { %v4806_v51 = vadd.f32 %v4805_v6, %v4801_v8  ;;  %v4793_v10 = vadd.f32 %v4792_v48, %v4788_v46  ;;  %v4789_v52 = vmul.f32 %v4774_v4, %v4743_v50  ;;  %v4745_v53 = vpop.f32.mrb[5].mxu1 }
 0x4ac   :  { %v4790_v28 = vmul.f32 %v4778_v47, %v4745_v53 }
 0x4ad   :  { %v4807_v54 = vadd.f32 %v4806_v51, %v4802_v49  ;;  %v4794_v55 = vadd.f32 %v4793_v10, %v4789_v52  ;;  %v4803_v57 = vmul.f32 %v4789_v52, %v4789_v52 }
 0x4ae   :  { %v4804_v58 = vmul.f32 %v4790_v28, %v4790_v28 }
 0x4af   :  { %v4808_v59 = vadd.f32 %v4807_v54, %v4803_v57  ;;  %v4795_v15 = vadd.f32 %v4794_v55, %v4790_v28 }
 0x4b1   :  { %4796 = vadd.xlane.f32.xlu0 %v4795_v15  ;;  %v4809_v60 = vadd.f32 %v4808_v59, %v4804_v58 }
 0x4b3   :  { %4810 = vadd.xlane.f32.xlu1 %v4809_v60 }
 0x53e   :  { %v4797_v3 = vpop.xlane.xlu0 %4796 }
 0x53f   :  { %v4798_v18 = vmul.f32 0.001953125, %v4797_v3 }
 0x540   :  { %v4811_v61 = vpop.xlane.xlu1 %4810 }
 0x541   :  { %v4813_v62 = vmul.f32 %v4798_v18, %v4798_v18  ;;  %v4812_v63 = vmul.f32 0.001953125, %v4811_v61 }
 0x543   :  { %v4814_v0 = vsub.f32 %v4812_v63, %v4813_v62 }
 0x545   :  { %v4815_v1 = vmax.f32 %v4814_v0, 0.0 }
 0x547   :  { %v4817_v5 = vadd.f32 1e-05, %v4815_v1 }
 0x549   :  { %5098 = vrsqrt.f32 %v4817_v5 }
 0x553   :  { %v5099_v12 = vpop.eup %5098 }
 0x554   :  { %v4819_v16 = vmul.f32 %v5099_v12, %v4816_v56 }
 0x556   :  { %4825 = vperm.xlu0 %5091, %v4819_v16   ;;  %v4821_v20 = vmul.f32 %v4819_v16, %v4798_v18 }
 0x558   :  { %v4822_v21 = vsub.f32 %v4820_v19, %v4821_v20 }
 0x55a   :  { %4836 = vperm.xlu1 %5092, %v4822_v21  }
 0x5d5   :  { %v4826_v23 = vpop.permute.xlu0 %4825 }
 0x5d6   :  { %v4828_v26 = vmul.f32 %v4826_v23, %v4601_v35  ;;  %v4829_v27 = vmul.f32 %v4826_v23, %v4603_v37  ;;  %v4830_v29 = vmul.f32 %v4826_v23, %v4672_v43  ;;  %v4831_v30 = vmul.f32 %v4826_v23, %v4674_v45 }
 0x5d7   :  { %v4832_v13 = vmul.f32 %v4826_v23, %v4743_v50  ;;  %v4833_v11 = vmul.f32 %v4826_v23, %v4745_v53 }
 0x5d9   :  { %v4837_v22 = vpop.permute.xlu1 %4836 }
 0x5da   :  { %v4839_v24 = vadd.f32 %v4837_v22, %v4828_v26  ;;  %v4840_v9 = vadd.f32 %v4837_v22, %v4829_v27  ;;  %v4841_v14 = vadd.f32 %v4837_v22, %v4830_v29  ;;  %v4842_v31 = vadd.f32 %v4837_v22, %v4831_v30 }
 0x5db   :  { %v4843_v17 = vadd.f32 %v4837_v22, %v4832_v13  ;;  %v4844_v32 = vadd.f32 %v4837_v22, %v4833_v11 }
 0x5dc   :  { %v4845_v7 = vmax.f32 %v4839_v24, 0.0  ;;  %v4846_v25 = vmax.f32 %v4840_v9, 0.0  ;;  %v4847_v33 = vmax.f32 %v4841_v14, 0.0  ;;  %v4848_v34 = vmax.f32 %v4842_v31, 0.0 }
 0x5dd   :  { %v4849_v36 = vmax.f32 %v4843_v17, 0.0  ;;  %v4850_v2 = vmax.f32 %v4844_v32, 0.0 }
 0x5de   :  { %4851 = vst [vmem:[%s5903_s9] sm:$0xff] %v4845_v7  ;;  %4852 = vst [vmem:[%s5903_s9 + $0x8] sm:$0xff] %v4846_v25 }
 0x5df   :  { %4853 = vst [vmem:[%s5903_s9 + $0x10] sm:$0xff] %v4847_v33  ;;  %4854 = vst [vmem:[%s5903_s9 + $0x18] sm:$0xff] %v4848_v34 }
 0x5e0   :  { %4855 = vst [vmem:[%s5903_s9 + $0x20] sm:$0xff] %v4849_v36  ;;  %4856 = vst [vmem:[%s5903_s9 + $0x28] sm:$0xff] %v4850_v2 }

</bundles_post_ra>
